<compile_context>
chip_gen: v5e
topology: v5e:2x2
jax: 0.10.0
libtpu: 0.0.40
codegen_flags: <defaults>
</compile_context>

<pallas_src>
import jax
import jax.numpy as jnp
from jax.experimental import pallas as pl
from jax.experimental.pallas import tpu as pltpu

LANE = 128
_BN_EPS = 1e-5


def _round_up(n, m):
    return ((n + m - 1) // m) * m


# ----------------------------- fused kernel -----------------------------

def _fused_mlp_kernel(x_ref, w1_ref, g1_ref, be1_ref,
                      w2_ref, g2_ref, be2_ref,
                      w3_ref, b3_ref, o_ref):
    """Single-grid-point fused forward:
       Linear1 -> BN(train) -> ReLU -> Linear2 -> BN(train) -> ReLU
       -> Linear3 (+bias) -> Sigmoid.  Everything stays in VMEM/vregs."""

    def bn_relu(h, g, be):
        # One pass over h producing both reductions (f32), then one
        # normalize+ReLU pass with a folded per-feature scale/shift.
        inv_b = jnp.float32(1.0 / h.shape[0])
        s1 = jnp.sum(h, axis=0, keepdims=True)
        s2 = jnp.sum(h * h, axis=0, keepdims=True)
        m = s1 * inv_b
        v = jnp.maximum(s2 * inv_b - m * m, 0.0)   # biased (train-mode) var
        s = g * jax.lax.rsqrt(v + jnp.float32(_BN_EPS))   # folded BN scale
        t = be - m * s                                    # folded BN shift
        return jnp.maximum(h * s + t, 0.0)

    h1 = jnp.dot(x_ref[...], w1_ref[...], preferred_element_type=jnp.float32)
    h1 = bn_relu(h1, g1_ref[...], be1_ref[...]).astype(jnp.bfloat16)

    h2 = jnp.dot(h1, w2_ref[...], preferred_element_type=jnp.float32)
    h2 = bn_relu(h2, g2_ref[...], be2_ref[...]).astype(jnp.bfloat16)

    logits = jnp.dot(h2, w3_ref[...],
                     preferred_element_type=jnp.float32) + b3_ref[...]
    o_ref[...] = jax.nn.sigmoid(logits)


def _fused_mlp(x, w1, g1, be1, w2, g2, be2, w3, b3):
    B = x.shape[0]
    NOp = w3.shape[1]
    vmem = pl.BlockSpec(memory_space=pltpu.MemorySpace.VMEM)
    return pl.pallas_call(
        _fused_mlp_kernel,
        out_shape=jax.ShapeDtypeStruct((B, NOp), jnp.float32),
        in_specs=[vmem] * 9,
        out_specs=vmem,
    )(x, w1, g1, be1, w2, g2, be2, w3, b3)


# ------------------------ param prep & wrapper ----------------------

def prepare_params(params):
    """One-time preprocessing: pad feature widths to multiples of 128 and
    pre-cast matmul weights to bf16.  b1/b2 are dropped (exactly cancelled by
    train-mode BN).  gamma/beta/b3 are zero-padded so padded columns are
    exactly 0 (layer-1/2) or 0.5 after sigmoid (head; sliced off)."""
    (w1, _b1, g1, be1, w2, _b2, g2, be2, w3, b3) = params
    k1, n1 = w1.shape
    n2 = w2.shape[1]
    no = w3.shape[1]
    n1p, n2p, nop = (_round_up(n, LANE) for n in (n1, n2, no))

    def pad2(a, rows, cols):
        return jnp.pad(a, ((0, rows - a.shape[0]), (0, cols - a.shape[1])))

    return dict(
        w1=pad2(w1, k1, n1p).astype(jnp.bfloat16),
        g1=pad2(g1, 1, n1p), be1=pad2(be1, 1, n1p),
        w2=pad2(w2, n1p, n2p).astype(jnp.bfloat16),
        g2=pad2(g2, 1, n2p), be2=pad2(be2, 1, n2p),
        w3=pad2(w3, n2p, nop).astype(jnp.bfloat16),
        b3=pad2(b3, 1, nop),
        out_dim=no,
    )


def mlp_forward(x, prep):
    out = _fused_mlp(
        x.astype(jnp.bfloat16),
        prep["w1"], prep["g1"], prep["be1"],
        prep["w2"], prep["g2"], prep["be2"],
        prep["w3"], prep["b3"],
    )
    return out[:, : prep["out_dim"]]


# --------------------------- init & references ---------------------------

def init_params(key, input_size, hidden_size, output_size):
    """Deterministic synthetic init (PyTorch-like uniform(-1/sqrt(fan_in), ...))."""
    h5 = hidden_size * 5
    h3 = hidden_size * 3

    def linear(key, fan_in, fan_out):
        kw, kb = jax.random.split(key)
        bound = 1.0 / (fan_in ** 0.5)
        w = jax.random.uniform(kw, (fan_in, fan_out), jnp.float32, -bound, bound)
        b = jax.random.uniform(kb, (1, fan_out), jnp.float32, -bound, bound)
        return w, b

    k1, k2, k3 = jax.random.split(key, 3)
    w1, b1 = linear(k1, input_size, h5)
    w2, b2 = linear(k2, h5, h3)
    w3, b3 = linear(k3, h3, output_size)

    g1 = jnp.ones((1, h5), jnp.float32)
    be1 = jnp.zeros((1, h5), jnp.float32)
    g2 = jnp.ones((1, h3), jnp.float32)
    be2 = jnp.zeros((1, h3), jnp.float32)

    return (w1, b1, g1, be1, w2, b2, g2, be2, w3, b3)


def reference_forward(x, params):
    """Faithful f32 PyTorch forward (train-mode BN, biases included)."""
    (w1, b1, g1, be1, w2, b2, g2, be2, w3, b3) = params

    def bn(h, g, be):
        m = jnp.mean(h, axis=0, keepdims=True)
        v = jnp.mean((h - m) ** 2, axis=0, keepdims=True)
        return (h - m) / jnp.sqrt(v + _BN_EPS) * g + be

    h = jnp.maximum(bn(x @ w1 + b1, g1, be1), 0.0)
    h = jnp.maximum(bn(h @ w2 + b2, g2, be2), 0.0)
    return jax.nn.sigmoid(h @ w3 + b3)


def reference_forward_kernel_arith(x, params):
    """Pure-JAX mirror of the kernel arithmetic (bf16 matmuls, folded BN,
    one-pass variance, b1/b2 dropped) for a tight numerical check."""
    (w1, _b1, g1, be1, w2, _b2, g2, be2, w3, b3) = params

    def layer(h_in, w, g, be):
        h = jnp.dot(h_in.astype(jnp.bfloat16), w.astype(jnp.bfloat16),
                    preferred_element_type=jnp.float32)
        m = jnp.mean(h, axis=0, keepdims=True)
        v = jnp.maximum(jnp.mean(h * h, axis=0, keepdims=True) - m * m, 0.0)
        s = g * jax.lax.rsqrt(v + jnp.float32(_BN_EPS))
        t = be - m * s
        return jnp.maximum(h * s + t, 0.0)

    h1 = layer(x, w1, g1, be1)
    h2 = layer(h1, w2, g2, be2)
    logits = jnp.dot(h2.astype(jnp.bfloat16), w3.astype(jnp.bfloat16),
                     preferred_element_type=jnp.float32) + b3
    return jax.nn.sigmoid(logits)


if __name__ == "__main__":
    batch = 128          # whole batch in one kernel (train-mode BN needs it)
    input_size = 32
    hidden_size = 32     # hidden widths 160 / 96 -> padded to 256 / 128
    output_size = 4      # padded to 128 lanes, sliced back to 4

    key = jax.random.PRNGKey(0)
    kx, kp = jax.random.split(key)
    x = jax.random.normal(kx, (batch, input_size), jnp.float32)
    params = init_params(kp, input_size, hidden_size, output_size)
    prep = prepare_params(params)

    out = jax.block_until_ready(mlp_forward(x, prep))
    assert out.shape == (batch, output_size)

    # Tight check vs. a pure-JAX model of the kernel's exact arithmetic.
    ref_k = reference_forward_kernel_arith(x, params)
    assert jnp.allclose(out, ref_k, atol=2e-3, rtol=0.0), "mismatch vs kernel-arith ref"

    # Loose check vs. the faithful f32 PyTorch-semantics forward; the only
    # difference is bf16 matmul rounding (b1/b2 cancel exactly under train-mode BN).
    ref = reference_forward(x, params)
    assert jnp.allclose(out, ref, atol=3e-2, rtol=0.0), "mismatch vs f32 reference"

    print("KERNEL_OK")
</pallas_src>

<mosaic_0001>
module attributes {stable_mosaic.version = 11 : i64} {
  func.func @_fused_mlp_kernel(%arg0: memref<128x32xbf16, #tpu.memory_space<vmem>>, %arg1: memref<32x256xbf16, #tpu.memory_space<vmem>>, %arg2: memref<1x256xf32, #tpu.memory_space<vmem>>, %arg3: memref<1x256xf32, #tpu.memory_space<vmem>>, %arg4: memref<256x128xbf16, #tpu.memory_space<vmem>>, %arg5: memref<1x128xf32, #tpu.memory_space<vmem>>, %arg6: memref<1x128xf32, #tpu.memory_space<vmem>>, %arg7: memref<128x128xbf16, #tpu.memory_space<vmem>>, %arg8: memref<1x128xf32, #tpu.memory_space<vmem>>, %arg9: memref<128x128xf32, #tpu.memory_space<vmem>>) attributes {dimension_semantics = [], scalar_prefetch = 0 : i64, scratch_operands = 0 : i64, tpu.core_type = #tpu.core_type<tc>} {
    %c0 = arith.constant 0 : index
    %c0_0 = arith.constant 0 : index
    %0 = vector.load %arg0[%c0, %c0_0] : memref<128x32xbf16, #tpu.memory_space<vmem>>, vector<128x32xbf16>
    %c0_1 = arith.constant 0 : index
    %c0_2 = arith.constant 0 : index
    %1 = vector.load %arg1[%c0_1, %c0_2] : memref<32x256xbf16, #tpu.memory_space<vmem>>, vector<32x256xbf16>
    %cst = arith.constant dense<0.000000e+00> : vector<128x256xf32>
    %2 = tpu.matmul %0, %1, %cst {dimension_numbers = #tpu.dot_dimension_numbers<[1], [0], [0], [1], [0, 0, 1, 1], [], []>} : vector<128x32xbf16>, vector<32x256xbf16>, vector<128x256xf32> -> vector<128x256xf32>
    %c0_3 = arith.constant 0 : index
    %c0_4 = arith.constant 0 : index
    %3 = vector.load %arg2[%c0_3, %c0_4] : memref<1x256xf32, #tpu.memory_space<vmem>>, vector<1x256xf32>
    %c0_5 = arith.constant 0 : index
    %c0_6 = arith.constant 0 : index
    %4 = vector.load %arg3[%c0_5, %c0_6] : memref<1x256xf32, #tpu.memory_space<vmem>>, vector<1x256xf32>
    %cst_7 = arith.constant dense<0.000000e+00> : vector<256xf32>
    %5 = vector.multi_reduction <add>, %2, %cst_7 [0] : vector<128x256xf32> to vector<256xf32>
    %6 = vector.shape_cast %5 : vector<256xf32> to vector<1x256xf32>
    %7 = arith.mulf %2, %2 : vector<128x256xf32>
    %cst_8 = arith.constant dense<0.000000e+00> : vector<256xf32>
    %8 = vector.multi_reduction <add>, %7, %cst_8 [0] : vector<128x256xf32> to vector<256xf32>
    %9 = vector.shape_cast %8 : vector<256xf32> to vector<1x256xf32>
    %cst_9 = arith.constant 7.812500e-03 : f32
    %10 = vector.broadcast %cst_9 : f32 to vector<1x256xf32>
    %11 = arith.mulf %6, %10 : vector<1x256xf32>
    %cst_10 = arith.constant 7.812500e-03 : f32
    %12 = vector.broadcast %cst_10 : f32 to vector<1x256xf32>
    %13 = arith.mulf %9, %12 : vector<1x256xf32>
    %14 = arith.mulf %11, %11 : vector<1x256xf32>
    %15 = arith.subf %13, %14 : vector<1x256xf32>
    %cst_11 = arith.constant 0.000000e+00 : f32
    %16 = vector.broadcast %cst_11 : f32 to vector<1x256xf32>
    %17 = arith.maximumf %15, %16 : vector<1x256xf32>
    %cst_12 = arith.constant 9.99999974E-6 : f32
    %18 = vector.broadcast %cst_12 : f32 to vector<1x256xf32>
    %19 = arith.addf %17, %18 : vector<1x256xf32>
    %20 = math.rsqrt %19 : vector<1x256xf32>
    %21 = arith.mulf %3, %20 : vector<1x256xf32>
    %22 = arith.mulf %11, %21 : vector<1x256xf32>
    %23 = arith.subf %4, %22 : vector<1x256xf32>
    %24 = vector.broadcast %21 : vector<1x256xf32> to vector<128x256xf32>
    %25 = arith.mulf %2, %24 : vector<128x256xf32>
    %26 = vector.broadcast %23 : vector<1x256xf32> to vector<128x256xf32>
    %27 = arith.addf %25, %26 : vector<128x256xf32>
    %cst_13 = arith.constant 0.000000e+00 : f32
    %28 = vector.broadcast %cst_13 : f32 to vector<128x256xf32>
    %29 = arith.maximumf %27, %28 : vector<128x256xf32>
    %30 = arith.truncf %29 : vector<128x256xf32> to vector<128x256xbf16>
    %c0_14 = arith.constant 0 : index
    %c0_15 = arith.constant 0 : index
    %31 = vector.load %arg4[%c0_14, %c0_15] : memref<256x128xbf16, #tpu.memory_space<vmem>>, vector<256x128xbf16>
    %cst_16 = arith.constant dense<0.000000e+00> : vector<128x128xf32>
    %32 = tpu.matmul %30, %31, %cst_16 {dimension_numbers = #tpu.dot_dimension_numbers<[1], [0], [0], [1], [0, 0, 1, 1], [], []>} : vector<128x256xbf16>, vector<256x128xbf16>, vector<128x128xf32> -> vector<128x128xf32>
    %c0_17 = arith.constant 0 : index
    %c0_18 = arith.constant 0 : index
    %33 = vector.load %arg5[%c0_17, %c0_18] : memref<1x128xf32, #tpu.memory_space<vmem>>, vector<1x128xf32>
    %c0_19 = arith.constant 0 : index
    %c0_20 = arith.constant 0 : index
    %34 = vector.load %arg6[%c0_19, %c0_20] : memref<1x128xf32, #tpu.memory_space<vmem>>, vector<1x128xf32>
    %cst_21 = arith.constant dense<0.000000e+00> : vector<128xf32>
    %35 = vector.multi_reduction <add>, %32, %cst_21 [0] : vector<128x128xf32> to vector<128xf32>
    %36 = vector.shape_cast %35 : vector<128xf32> to vector<1x128xf32>
    %37 = arith.mulf %32, %32 : vector<128x128xf32>
    %cst_22 = arith.constant dense<0.000000e+00> : vector<128xf32>
    %38 = vector.multi_reduction <add>, %37, %cst_22 [0] : vector<128x128xf32> to vector<128xf32>
    %39 = vector.shape_cast %38 : vector<128xf32> to vector<1x128xf32>
    %cst_23 = arith.constant 7.812500e-03 : f32
    %40 = vector.broadcast %cst_23 : f32 to vector<1x128xf32>
    %41 = arith.mulf %36, %40 : vector<1x128xf32>
    %cst_24 = arith.constant 7.812500e-03 : f32
    %42 = vector.broadcast %cst_24 : f32 to vector<1x128xf32>
    %43 = arith.mulf %39, %42 : vector<1x128xf32>
    %44 = arith.mulf %41, %41 : vector<1x128xf32>
    %45 = arith.subf %43, %44 : vector<1x128xf32>
    %cst_25 = arith.constant 0.000000e+00 : f32
    %46 = vector.broadcast %cst_25 : f32 to vector<1x128xf32>
    %47 = arith.maximumf %45, %46 : vector<1x128xf32>
    %cst_26 = arith.constant 9.99999974E-6 : f32
    %48 = vector.broadcast %cst_26 : f32 to vector<1x128xf32>
    %49 = arith.addf %47, %48 : vector<1x128xf32>
    %50 = math.rsqrt %49 : vector<1x128xf32>
    %51 = arith.mulf %33, %50 : vector<1x128xf32>
    %52 = arith.mulf %41, %51 : vector<1x128xf32>
    %53 = arith.subf %34, %52 : vector<1x128xf32>
    %54 = vector.broadcast %51 : vector<1x128xf32> to vector<128x128xf32>
    %55 = arith.mulf %32, %54 : vector<128x128xf32>
    %56 = vector.broadcast %53 : vector<1x128xf32> to vector<128x128xf32>
    %57 = arith.addf %55, %56 : vector<128x128xf32>
    %cst_27 = arith.constant 0.000000e+00 : f32
    %58 = vector.broadcast %cst_27 : f32 to vector<128x128xf32>
    %59 = arith.maximumf %57, %58 : vector<128x128xf32>
    %60 = arith.truncf %59 : vector<128x128xf32> to vector<128x128xbf16>
    %c0_28 = arith.constant 0 : index
    %c0_29 = arith.constant 0 : index
    %61 = vector.load %arg7[%c0_28, %c0_29] : memref<128x128xbf16, #tpu.memory_space<vmem>>, vector<128x128xbf16>
    %cst_30 = arith.constant dense<0.000000e+00> : vector<128x128xf32>
    %62 = tpu.matmul %60, %61, %cst_30 {dimension_numbers = #tpu.dot_dimension_numbers<[1], [0], [0], [1], [0, 0, 1, 1], [], []>} : vector<128x128xbf16>, vector<128x128xbf16>, vector<128x128xf32> -> vector<128x128xf32>
    %c0_31 = arith.constant 0 : index
    %c0_32 = arith.constant 0 : index
    %63 = vector.load %arg8[%c0_31, %c0_32] : memref<1x128xf32, #tpu.memory_space<vmem>>, vector<1x128xf32>
    %64 = vector.broadcast %63 : vector<1x128xf32> to vector<128x128xf32>
    %65 = arith.addf %62, %64 : vector<128x128xf32>
    %66 = arith.negf %65 : vector<128x128xf32>
    %67 = math.exp %66 : vector<128x128xf32>
    %cst_33 = arith.constant 1.000000e+00 : f32
    %68 = vector.broadcast %cst_33 : f32 to vector<128x128xf32>
    %69 = arith.addf %68, %67 : vector<128x128xf32>
    %70 = arith.divf %68, %69 : vector<128x128xf32>
    %c0_34 = arith.constant 0 : index
    %c0_35 = arith.constant 0 : index
    %71 = vector.load %arg9[%c0_34, %c0_35] : memref<128x128xf32, #tpu.memory_space<vmem>>, vector<128x128xf32>
    tpu.vector_store %arg9[%c0_34, %c0_35], %70 {strides = array<i32>} : memref<128x128xf32, #tpu.memory_space<vmem>>, vector<128x128xf32>,
    return
  }
}

</mosaic_0001>

<bundles_post_ra>
// kernel: tpu_custom_call.1
= control target key start
LH: loop header
LB: loop body
LE: loop exit
PB: predicated region body
PF: predicated region fallthrough
CT: control target
= control target key end

     0   :  { %14 = vsyncpa [#allocation3], 0  ;;  %s2293_s0 = inlined_call_operand.vmem [shape: bf16[128,32], index: 0, kind: input, shape index: {}]   ;;  %s2294_s1 = inlined_call_operand.hbm [shape: bf16[32,256], index: 1, kind: input, shape index: {}]   ;;  %s2295_s2 = inlined_call_operand.vmem [shape: f32[1,256], index: 2, kind: input, shape index: {}]   ;;  %s2296_s3 = inlined_call_operand.vmem [shape: f32[1,256], index: 3, kind: input, shape index: {}]   ;;  %s2297_s4 = inlined_call_operand.hbm [shape: bf16[256,128], index: 4, kind: input, shape index: {}]   ;;  %s2298_s5 = inlined_call_operand.vmem [shape: f32[1,128], index: 5, kind: input, shape index: {}]   ;;  %s2299_s6 = inlined_call_operand.vmem [shape: f32[1,128], index: 6, kind: input, shape index: {}]   ;;  %s2300_s7 = inlined_call_operand.vmem [shape: bf16[128,128], index: 7, kind: input, shape index: {}]   ;;  %s2301_s8 = inlined_call_operand.vmem [shape: f32[1,128], index: 8, kind: input, shape index: {}]   ;;  %s2302_s9 = inlined_call_operand.hbm [shape: f32[128,128], index: 9, kind: output, shape index: {}]  }
   0x1   :  { %15 = vsyncpa [#allocation6], 0 }
   0x2   :  { %16 = vsyncpa [#allocation4], 0  ;;  %s23_s11 = sshll.u32 %s2294_s1, 4  ;;  %s1754_s12 = smov [#allocation2]   ;;  %s24_s11 = int_to_ptr.hbm [resolvable:$true] %s23_s11 }
   0x3   :  { %s25_s13 = sshll.u32 %s1754_s12, 4  ;;  %s40_s16 = sshll.u32 %s2297_s4, 4  ;;  %s26_s13 = int_to_ptr.vmem [resolvable:$true] %s25_s13  ;;  %s41_s16 = int_to_ptr.hbm [resolvable:$true] %s40_s16 }
   0x4   :  { %s1755_s17 = smov 128   ;;  %s1756_s18 = smov 8  }
   0x5   :  { %31 = dma.hbm_to_vmem [thread:$0]  %s24_s11, 512, %s26_s13, [#allocation3], %s1755_s17, %s1755_s17, %s1756_s18  }
   0x6   :  { %s1757_s19 = smov [#allocation5]   ;;  %s1758_s21 = smov 64  }
   0x7   :  { %s42_s20 = sshll.u32 %s1757_s19, 4  ;;  %s1759_s1 = smov 4   ;;  %s43_s20 = int_to_ptr.vmem [resolvable:$true] %s42_s20 }
   0x8   :  { %48 = dma.hbm_to_vmem [thread:$0]  %s41_s16, 2048, %s43_s20, [#allocation6], %s1758_s21, %s1758_s21, %s1759_s1  }
   0x9   :  { %1748 = dma.done.wait [#allocation3], 512  }
   0xa   :  { %1749 = vsyncadd [#allocation3], 4294966784 }
   0xb   :  { %1750 = dma.done.wait [#allocation6], 2048  }
   0xc   :  { %1751 = vsyncadd [#allocation6], 4294965248  ;;  %v1422_v0 = vld [vmem:[#allocation2 + $0x10] sm:$0xf]  ;;  %v1567_v1 = vld [vmem:[#allocation2 + $0x14] sm:$0xf0] }
   0xd   :  { %v1414_v2 = vld [vmem:[#allocation2] sm:$0xf]  ;;  %v1423_v3 = vor.u32 %v1567_v1, %v1422_v0  ;;  %v1565_v4 = vld [vmem:[#allocation2 + $0x4] sm:$0xf0]  ;;  %v1566_v5 = vld [vmem:[#allocation2 + $0x14] sm:$0xf] }
   0xe   :  { %v1424_v6 = vld [vmem:[#allocation2 + $0x18] sm:$0xf0]  ;;  %v1415_v7 = vor.u32 %v1565_v4, %v1414_v2  ;;  %v1564_v9 = vld [vmem:[#allocation2 + $0x4] sm:$0xf]  ;;  %v1416_v10 = vld [vmem:[#allocation2 + $0x8] sm:$0xf0] }
   0xf   :  { %177 = vmatpush.bf16.msra.mxu0 %v1423_v3  ;;  %1592 = vmatpush.bf16.msra.mxu1 %v1423_v3  ;;  %v1427_v8 = vor.u32 %v1566_v5, %v1424_v6  ;;  %v1556_v11 = vld [vmem:[%s2293_s0] sm:$0xff]  ;;  %v1558_v12 = vld [vmem:[%s2293_s0 + $0x10] sm:$0xff]  ;;  %vm146_vm0 = vcmask 261120   ;;  %v1561_v13 = vld [vmem:[%s2293_s0 + $0x28] sm:$0xff]  ;;  %v1419_v14 = vor.u32 %v1564_v9, %v1416_v10  ;;  %vm422_vm6 = vcmask 1040384   ;;  %s1366_s19 = sshll.u32 %s2302_s9, 4  ;;  %s1367_s19 = int_to_ptr.hbm [resolvable:$true] %s1366_s19 }
  0x10   :  { %1593 = vmatpush.bf16.msra.mxu2 %v1423_v3  ;;  %1594 = vmatpush.bf16.msra.mxu3 %v1423_v3  ;;  %v1563_v15 = vld [vmem:[%s2293_s0 + $0x38] sm:$0xff]  ;;  %v1557_v16 = vld [vmem:[%s2293_s0 + $0x8] sm:$0xff]  ;;  %v1562_v18 = vld [vmem:[%s2293_s0 + $0x30] sm:$0xff] }
  0x11   :  { %v1559_v17 = vld [vmem:[%s2293_s0 + $0x18] sm:$0xff]  ;;  %v1560_v19 = vld [vmem:[%s2293_s0 + $0x20] sm:$0xff] }
  0x13   :  { %178 = vmatpush.bf16.msra.mxu0 %v1415_v7  ;;  %1595 = vmatpush.bf16.msra.mxu1 %v1415_v7 }
  0x14   :  { %1596 = vmatpush.bf16.msra.mxu2 %v1415_v7  ;;  %1597 = vmatpush.bf16.msra.mxu3 %v1415_v7 }
  0x16   :  { %1428 = vmatmul.msk.bf16.vlgmr.msra.gmra.mxu0 %vm146_vm0, %v1556_v11  ;;  %1430 = vmatmul.msk.bf16.vlgmr.msra.gmra.mxu1 %vm146_vm0, %v1558_v12 }
  0x17   :  { %226 = vmatpush.bf16.msrb.mxu1 %v1427_v8  ;;  %1433 = vmatmul.msk.bf16.vlgmr.msra.gmra.mxu2 %vm146_vm0, %v1561_v13 }
  0x18   :  { %1435 = vmatmul.msk.bf16.vlgmr.msra.gmra.mxu3 %vm146_vm0, %v1563_v15 }
  0x1b   :  { %227 = vmatpush.bf16.msrb.mxu1 %v1419_v14 }
  0x26   :  { %1429 = vmatmul.msk.bf16.gmra.mxu0 %vm146_vm0, %v1557_v16  ;;  %1431 = vmatmul.msk.bf16.gmra.mxu1 %vm146_vm0, %v1559_v17 }
  0x27   :  { %1434 = vmatmul.msk.bf16.gmra.mxu2 %vm146_vm0, %v1562_v18 }
  0x36   :  { %1432 = vmatmul.msk.bf16.gmra.mxu1 %vm146_vm0, %v1560_v19 }
  0x46   :  { %1436 = vmatmul.msk.bf16.vlgmr.msrb.gmra.mxu1 %vm146_vm0, %v1556_v11 }
  0x56   :  { %1437 = vmatmul.msk.bf16.gmra.mxu1 %vm146_vm0, %v1557_v16 }
  0x66   :  { %1438 = vmatmul.msk.bf16.gmra.mxu1 %vm146_vm0, %v1558_v12 }
  0x76   :  { %1439 = vmatmul.msk.bf16.gmra.mxu1 %vm146_vm0, %v1559_v17 }
  0x86   :  { %1440 = vmatmul.msk.bf16.gmra.mxu1 %vm146_vm0, %v1560_v19 }
  0x93   :  { %v1857_v20 = vpop.f32.mrf.mxu1  ;;  %v1874_v27 = vpop.f32.mrf.mxu0 }
  0x94   :  { %v313_v33 = vmul.f32 %v1874_v27, %v1874_v27  ;;  %v321_v48 = vmul.f32 %v1857_v20, %v1857_v20 }
  0x96   :  { %1441 = vmatmul.msk.bf16.gmra.mxu1 %vm146_vm0, %v1561_v13 }
  0x9a   :  { %v1905_v47 = vpop.f32.mrf.mxu2 }
  0x9b   :  { %v1860_v21 = vpop.f32.mrf.mxu1  ;;  %v1880_v30 = vpop.f32.mrf.mxu0  ;;  %v333_v5 = vmul.f32 %v1905_v47, %v1905_v47 }
  0x9c   :  { %v315_v34 = vmul.f32 %v1880_v30, %v1880_v30  ;;  %v271_v36 = vadd.f32 %v1880_v30, %v1874_v27  ;;  %v323_v52 = vmul.f32 %v1860_v21, %v1860_v21  ;;  %v1942_v12 = vpop.f32.mrf.mxu3 }
  0x9e   :  { %v345_v37 = vadd.f32 %v315_v34, %v313_v33  ;;  %v341_v34 = vmul.f32 %v1942_v12, %v1942_v12 }
  0xa2   :  { %v1917_v56 = vpop.f32.mrf.mxu2 }
  0xa3   :  { %v1862_v22 = vpop.f32.mrf.mxu1  ;;  %v1884_v32 = vpop.f32.mrf.mxu0  ;;  %v335_v8 = vmul.f32 %v1917_v56, %v1917_v56 }
  0xa4   :  { %v317_v38 = vmul.f32 %v1884_v32, %v1884_v32  ;;  %v272_v39 = vadd.f32 %v271_v36, %v1884_v32  ;;  %v325_v55 = vmul.f32 %v1862_v22, %v1862_v22 }
  0xa6   :  { %1442 = vmatmul.msk.bf16.gmra.mxu1 %vm146_vm0, %v1562_v18  ;;  %v346_v41 = vadd.f32 %v345_v37, %v317_v38  ;;  %v1956_v37 = vpop.f32.mrf.mxu3 }
  0xaa   :  { %v1932_v4 = vpop.f32.mrf.mxu2 }
  0xab   :  { %v1865_v23 = vpop.f32.mrf.mxu1  ;;  %v1897_v40 = vpop.f32.mrf.mxu0  ;;  %v337_v13 = vmul.f32 %v1932_v4, %v1932_v4 }
  0xac   :  { %v319_v42 = vmul.f32 %v1897_v40, %v1897_v40  ;;  %v273_v44 = vadd.f32 %v272_v39, %v1897_v40  ;;  %v327_v60 = vmul.f32 %v1865_v23, %v1865_v23  ;;  %v343_v39 = vmul.f32 %v1956_v37, %v1956_v37 }
  0xae   :  { %v347_v45 = vadd.f32 %v346_v41, %v319_v42  ;;  %v274_v46 = vadd.f32 %v273_v44, %v1857_v20 }
  0xb0   :  { %v348_v49 = vadd.f32 %v347_v45, %v321_v48  ;;  %v275_v51 = vadd.f32 %v274_v46, %v1860_v21 }
  0xb2   :  { %v349_v53 = vadd.f32 %v348_v49, %v323_v52  ;;  %v276_v54 = vadd.f32 %v275_v51, %v1862_v22  ;;  %v1947_v16 = vpop.f32.mrf.mxu2 }
  0xb3   :  { %v1867_v24 = vpop.f32.mrf.mxu1  ;;  %v339_v18 = vmul.f32 %v1947_v16, %v1947_v16 }
  0xb4   :  { %v350_v57 = vadd.f32 %v349_v53, %v325_v55  ;;  %v277_v59 = vadd.f32 %v276_v54, %v1865_v23  ;;  %v329_v63 = vmul.f32 %v1867_v24, %v1867_v24 }
  0xb6   :  { %1443 = vmatmul.msk.bf16.gmra.mxu1 %vm146_vm0, %v1563_v15  ;;  %v351_v61 = vadd.f32 %v350_v57, %v327_v60  ;;  %v278_v62 = vadd.f32 %v277_v59, %v1867_v24 }
  0xb8   :  { %v352_v2 = vadd.f32 %v351_v61, %v329_v63 }
  0xbb   :  { %v1870_v25 = vpop.f32.mrf.mxu1 }
  0xbc   :  { %v331_v0 = vmul.f32 %v1870_v25, %v1870_v25  ;;  %v279_v1 = vadd.f32 %v278_v62, %v1870_v25 }
  0xbe   :  { %v353_v6 = vadd.f32 %v352_v2, %v331_v0  ;;  %v280_v7 = vadd.f32 %v279_v1, %v1905_v47 }
  0xc0   :  { %v354_v9 = vadd.f32 %v353_v6, %v333_v5  ;;  %v281_v10 = vadd.f32 %v280_v7, %v1917_v56 }
  0xc2   :  { %v355_v14 = vadd.f32 %v354_v9, %v335_v8  ;;  %v282_v15 = vadd.f32 %v281_v10, %v1932_v4 }
  0xc3   :  { %v1872_v26 = vpop.f32.mrf.mxu1 }
  0xc4   :  { %v356_v17 = vadd.f32 %v355_v14, %v337_v13  ;;  %v283_v19 = vadd.f32 %v282_v15, %v1947_v16  ;;  %v314_v49 = vmul.f32 %v1872_v26, %v1872_v26 }
  0xc6   :  { %v357_v36 = vadd.f32 %v356_v17, %v339_v18  ;;  %v284_v38 = vadd.f32 %v283_v19, %v1942_v12 }
  0xc8   :  { %v358_v41 = vadd.f32 %v357_v36, %v341_v34  ;;  %v285_v42 = vadd.f32 %v284_v38, %v1956_v37 }
  0xca   :  { %v359_v45 = vadd.f32 %v358_v41, %v343_v39  ;;  %v286_v46 = vrot.slane %v285_v42, 4 }
  0xcb   :  { %v1876_v28 = vpop.f32.mrf.mxu1 }
  0xcc   :  { %v316_v48 = vmul.f32 %v1876_v28, %v1876_v28  ;;  %v292_v51 = vadd.f32 %v1876_v28, %v1872_v26  ;;  %v360_v53 = vrot.slane %v359_v45, 4  ;;  %v287_v54 = vadd.f32 %v286_v46, %v285_v42 }
  0xce   :  { %v366_v55 = vadd.f32 %v316_v48, %v314_v49  ;;  %v361_v0 = vadd.f32 %v360_v53, %v359_v45  ;;  %v288_v1 = vrot.slane %v287_v54, 2 }
  0xd0   :  { %v362_v10 = vrot.slane %v361_v0, 2  ;;  %v289_v13 = vadd.f32 %v288_v1, %v287_v54 }
  0xd2   :  { %v363_v38 = vadd.f32 %v362_v10, %v361_v0  ;;  %v290_v39 = vrot.slane %v289_v13, 1 }
  0xd3   :  { %v1878_v29 = vpop.f32.mrf.mxu1 }
  0xd4   :  { %v318_v52 = vmul.f32 %v1878_v29, %v1878_v29  ;;  %v293_v57 = vadd.f32 %v292_v51, %v1878_v29  ;;  %v364_v51 = vrot.slane %v363_v38, 1 }
  0xd6   :  { %v367_v61 = vadd.f32 %v366_v55, %v318_v52  ;;  %v291_v52 = vadd.f32 %v290_v39, %v289_v13 }
  0xd8   :  { %v2008_v0 = vmul.f32 0.0078125, %v291_v52 }
  0xda   :  { %v391_v10 = vmul.f32 %v2008_v0, %v2008_v0 }
  0xdb   :  { %v1882_v31 = vpop.f32.mrf.mxu1 }
  0xdc   :  { %v320_v59 = vmul.f32 %v1882_v31, %v1882_v31  ;;  %v294_v62 = vadd.f32 %v293_v57, %v1882_v31 }
  0xde   :  { %v368_v2 = vadd.f32 %v367_v61, %v320_v59 }
  0xe3   :  { %v1890_v35 = vpop.f32.mrf.mxu1 }
  0xe4   :  { %v322_v63 = vmul.f32 %v1890_v35, %v1890_v35  ;;  %v295_v5 = vadd.f32 %v294_v62, %v1890_v35 }
  0xe6   :  { %v369_v7 = vadd.f32 %v368_v2, %v322_v63  ;;  %v365_v63 = vadd.f32 %v364_v51, %v363_v38 }
  0xeb   :  { %v1901_v43 = vpop.f32.mrf.mxu1 }
  0xec   :  { %v324_v6 = vmul.f32 %v1901_v43, %v1901_v43  ;;  %v296_v8 = vadd.f32 %v295_v5, %v1901_v43 }
  0xee   :  { %v370_v14 = vadd.f32 %v369_v7, %v324_v6 }
  0xf3   :  { %v1909_v50 = vpop.f32.mrf.mxu1 }
  0xf4   :  { %v326_v9 = vmul.f32 %v1909_v50, %v1909_v50  ;;  %v297_v15 = vadd.f32 %v296_v8, %v1909_v50 }
  0xf6   :  { %v371_v19 = vadd.f32 %v370_v14, %v326_v9  ;;  %v389_v9 = vmul.f32 0.0078125, %v365_v63 }
  0xf8   :  { %v393_v39 = vsub.f32 %v389_v9, %v391_v10  ;;  %v1571_v10 = vld [vmem:[#allocation5 + $0x18] sm:$0xff] }
  0xfa   :  { %v395_v51 = vmax.f32 %v393_v39, 0.0 }
  0xfb   :  { %v1919_v58 = vpop.f32.mrf.mxu1 }
  0xfc   :  { %v328_v17 = vmul.f32 %v1919_v58, %v1919_v58  ;;  %v298_v34 = vadd.f32 %v297_v15, %v1919_v58 }
  0xfe   :  { %v372_v41 = vadd.f32 %v371_v19, %v328_v17  ;;  %v1575_v17 = vld [vmem:[#allocation5 + $0x38] sm:$0xff] }
  0xff   :  { %v1583_v19 = vld [vmem:[#allocation5 + $0x78] sm:$0xff]  ;;  %684 = vmatpush.bf16.msrb.mxu2 %v1575_v17 }
 0x100   :  { %733 = vmatpush.bf16.msrb.mxu3 %v1583_v19 }
 0x103   :  { %v1930_v3 = vpop.f32.mrf.mxu1 }
 0x104   :  { %v330_v36 = vmul.f32 %v1930_v3, %v1930_v3  ;;  %v299_v42 = vadd.f32 %v298_v34, %v1930_v3 }
 0x106   :  { %v373_v46 = vadd.f32 %v372_v41, %v330_v36 }
 0x10b   :  { %v1940_v11 = vpop.f32.mrf.mxu1 }
 0x10c   :  { %v332_v45 = vmul.f32 %v1940_v11, %v1940_v11  ;;  %v300_v48 = vadd.f32 %v299_v42, %v1940_v11 }
 0x10e   :  { %v374_v53 = vadd.f32 %v373_v46, %v332_v45  ;;  %v1574_v45 = vld [vmem:[#allocation5 + $0x30] sm:$0xff] }
 0x10f   :  { %v1582_v46 = vld [vmem:[#allocation5 + $0x70] sm:$0xff]  ;;  %685 = vmatpush.bf16.msrb.mxu2 %v1574_v45  ;;  %v1569_v45 = vld [vmem:[#allocation5 + $0x8] sm:$0xff] }
 0x110   :  { %734 = vmatpush.bf16.msrb.mxu3 %v1582_v46  ;;  %v1577_v46 = vld [vmem:[#allocation5 + $0x48] sm:$0xff] }
 0x113   :  { %v1952_v33 = vpop.f32.mrf.mxu1 }
 0x114   :  { %v334_v49 = vmul.f32 %v1952_v33, %v1952_v33  ;;  %v301_v54 = vadd.f32 %v300_v48, %v1952_v33 }
 0x116   :  { %v375_v59 = vadd.f32 %v374_v53, %v334_v49 }
 0x11b   :  { %v1962_v44 = vpop.f32.mrf.mxu1 }
 0x11c   :  { %v336_v55 = vmul.f32 %v1962_v44, %v1962_v44  ;;  %v302_v61 = vadd.f32 %v301_v54, %v1962_v44  ;;  %v1573_v54 = vld [vmem:[#allocation5 + $0x28] sm:$0xff] }
 0x11d   :  { %686 = vmatpush.bf16.msrb.mxu2 %v1573_v54 }
 0x11e   :  { %v376_v1 = vadd.f32 %v375_v59, %v336_v55  ;;  %v1581_v55 = vld [vmem:[#allocation5 + $0x68] sm:$0xff] }
 0x11f   :  { %735 = vmatpush.bf16.msrb.mxu3 %v1581_v55 }
 0x123   :  { %v1975_v60 = vpop.f32.mrf.mxu1 }
 0x124   :  { %v338_v62 = vmul.f32 %v1975_v60, %v1975_v60  ;;  %v303_v2 = vadd.f32 %v302_v61, %v1975_v60 }
 0x126   :  { %v377_v6 = vadd.f32 %v376_v1, %v338_v62  ;;  %v397_v62 = vadd.f32 1e-05, %v395_v51 }
 0x128   :  { %1606 = vrsqrt.f32 %v397_v62  ;;  %vm405_vm5 = vweird.f32 %v397_v62 }
 0x12b   :  { %v1989_v18 = vpop.f32.mrf.mxu1 }
 0x12c   :  { %v340_v5 = vmul.f32 %v1989_v18, %v1989_v18  ;;  %v304_v7 = vadd.f32 %v303_v2, %v1989_v18  ;;  %v1572_v2 = vld [vmem:[#allocation5 + $0x20] sm:$0xff] }
 0x12d   :  { %687 = vmatpush.bf16.msrb.mxu2 %v1572_v2 }
 0x12e   :  { %v378_v13 = vadd.f32 %v377_v6, %v340_v5  ;;  %v1580_v5 = vld [vmem:[#allocation5 + $0x60] sm:$0xff] }
 0x12f   :  { %736 = vmatpush.bf16.msrb.mxu3 %v1580_v5 }
 0x131   :  { %688 = vmatpush.bf16.msrb.mxu2 %v1571_v10 }
 0x133   :  { %v2003_v57 = vpop.f32.mrf.mxu1 }
 0x134   :  { %v342_v8 = vmul.f32 %v2003_v57, %v2003_v57  ;;  %v305_v14 = vadd.f32 %v304_v7, %v2003_v57 }
 0x136   :  { %v379_v34 = vadd.f32 %v378_v13, %v342_v8  ;;  %v1579_v13 = vld [vmem:[#allocation5 + $0x58] sm:$0xff] }
 0x137   :  { %737 = vmatpush.bf16.msrb.mxu3 %v1579_v13 }
 0x13b   :  { %v2019_v15 = vpop.f32.mrf.mxu1 }
 0x13c   :  { %v306_v36 = vadd.f32 %v305_v14, %v2019_v15  ;;  %v344_v38 = vmul.f32 %v2019_v15, %v2019_v15 }
 0x13e   :  { %v307_v41 = vrot.slane %v306_v36, 4  ;;  %v380_v42 = vadd.f32 %v379_v34, %v344_v38  ;;  %v1570_v34 = vld [vmem:[#allocation5 + $0x10] sm:$0xff]  ;;  %v1607_v38 = vpop.eup %1606 }
 0x13f   :  { %689 = vmatpush.bf16.msrb.mxu2 %v1570_v34  ;;  %vm406_vm2 = vweird.f32 %v1607_v38  ;;  %v270_v34 = vld [vmem:[%s2296_s3] sm:$0x3] }
 0x140   :  { %v308_v48 = vadd.f32 %v307_v41, %v306_v36  ;;  %v381_v49 = vrot.slane %v380_v42, 4  ;;  %v1578_v36 = vld [vmem:[#allocation5 + $0x50] sm:$0xff]  ;;  %vm407_vm7 = vmor %vm405_vm5, %vm406_vm2 }
 0x141   :  { %738 = vmatpush.bf16.msrb.mxu3 %v1578_v36 }
 0x142   :  { %v309_v52 = vrot.slane %v308_v48, 2  ;;  %v382_v53 = vadd.f32 %v381_v49, %v380_v42  ;;  %v400_v42 = vmul.f32 %v1607_v38, %v397_v62  ;;  %v1576_v49 = vld [vmem:[#allocation5 + $0x40] sm:$0xff] }
 0x143   :  { %690 = vmatpush.bf16.msrb.mxu2 %v1569_v45 }
 0x144   :  { %v310_v59 = vadd.f32 %v309_v52, %v308_v48  ;;  %v383_v61 = vrot.slane %v382_v53, 2  ;;  %v1568_v48 = vld [vmem:[#allocation5] sm:$0xff]  ;;  %v401_v51 = vmul.f32 %v1607_v38, %v400_v42 }
 0x145   :  { %739 = vmatpush.bf16.msrb.mxu3 %v1577_v46 }
 0x146   :  { %v311_v63 = vrot.slane %v310_v59, 1  ;;  %v384_v1 = vadd.f32 %v383_v61, %v382_v53  ;;  %v402_v53 = vmul.f32 0.5, %v401_v51 }
 0x147   :  { %691 = vmatpush.bf16.msrb.mxu2 %v1568_v48 }
 0x148   :  { %v312_v6 = vadd.f32 %v311_v63, %v310_v59  ;;  %v385_v7 = vrot.slane %v384_v1, 1  ;;  %v403_v59 = vsub.f32 1.5, %v402_v53 }
 0x149   :  { %740 = vmatpush.bf16.msrb.mxu3 %v1576_v49 }
 0x14a   :  { %v386_v8 = vadd.f32 %v385_v7, %v384_v1  ;;  %v388_v9 = vmul.f32 0.0078125, %v312_v6  ;;  %v404_v1 = vmul.f32 %v1607_v38, %v403_v59  ;;  %v269_v6 = vld [vmem:[%s2295_s2] sm:$0x3] }
 0x14c   :  { %v390_v14 = vmul.f32 0.0078125, %v386_v8  ;;  %v392_v17 = vmul.f32 %v388_v9, %v388_v9  ;;  %v408_v8 = vsel %vm407_vm7, %v1607_v38, %v404_v1 }
 0x14e   :  { %v394_v19 = vsub.f32 %v390_v14, %v392_v17 }
 0x150   :  { %v396_v39 = vmax.f32 %v394_v19, 0.0 }
 0x152   :  { %v398_v41 = vadd.f32 1e-05, %v396_v39 }
 0x154   :  { %1608 = vrsqrt.f32 %v398_v41  ;;  %vm415_vm3 = vweird.f32 %v398_v41 }
 0x15a   :  { %v1609_v52 = vpop.eup %1608 }
 0x15b   :  { %v410_v54 = vmul.f32 %v1609_v52, %v398_v41  ;;  %vm416_vm1 = vweird.f32 %v1609_v52 }
 0x15c   :  { %vm417_vm4 = vmor %vm415_vm3, %vm416_vm1 }
 0x15d   :  { %v411_v55 = vmul.f32 %v1609_v52, %v410_v54 }
 0x15f   :  { %v412_v61 = vmul.f32 0.5, %v411_v55 }
 0x161   :  { %v413_v63 = vsub.f32 1.5, %v412_v61 }
 0x163   :  { %v414_v2 = vmul.f32 %v1609_v52, %v413_v63 }
 0x165   :  { %v418_v5 = vsel %vm417_vm4, %v1609_v52, %v414_v2 }
 0x166   :  { %v421_v7 = vrot.slane %v418_v5, 7 }
 0x168   :  { %v423_v10 = vsel %vm422_vm6, %v408_v8, %v421_v7 }
 0x169   :  { %v425_v13 = vmul.f32 %v423_v10, %v269_v6 }
 0x16b   :  { %v2027_v14 = vperm.slane %v425_v13, 0  ;;  %v2029_v17 = vperm.slane %v425_v13, 1 }
 0x16d   :  { %v432_v19 = vmul.f32 %v2029_v17, %v388_v9  ;;  %v470_v62 = vmul.f32 %v2029_v17, %v2019_v15  ;;  %v431_v36 = vmul.f32 %v2027_v14, %v2008_v0  ;;  %v439_v42 = vmul.f32 %v2027_v14, %v1874_v27 }
 0x16e   :  { %v441_v15 = vmul.f32 %v2027_v14, %v1880_v30  ;;  %v440_v9 = vmul.f32 %v2029_v17, %v1872_v26  ;;  %v442_v48 = vmul.f32 %v2029_v17, %v1876_v28  ;;  %v443_v26 = vmul.f32 %v2027_v14, %v1884_v32 }
 0x16f   :  { %v435_v39 = vrot.slane %v432_v19, 7  ;;  %v445_v28 = vmul.f32 %v2027_v14, %v1897_v40  ;;  %v444_v61 = vmul.f32 %v2029_v17, %v1878_v29  ;;  %v446_v63 = vmul.f32 %v2029_v17, %v1882_v31 }
 0x170   :  { %v455_v5 = vmul.f32 %v2027_v14, %v1867_v24  ;;  %v457_v6 = vmul.f32 %v2027_v14, %v1870_v25  ;;  %v456_v40 = vmul.f32 %v2029_v17, %v1930_v3  ;;  %v458_v29 = vmul.f32 %v2029_v17, %v1940_v11 }
 0x171   :  { %v436_v38 = vsel %vm422_vm6, %v431_v36, %v435_v39  ;;  %v459_v31 = vmul.f32 %v2027_v14, %v1905_v47  ;;  %v461_v24 = vmul.f32 %v2027_v14, %v1917_v56  ;;  %v460_v25 = vmul.f32 %v2029_v17, %v1952_v33 }
 0x172   :  { %v438_v41 = vsub.f32 %v270_v34, %v436_v38  ;;  %v462_v8 = vmul.f32 %v2029_v17, %v1962_v44  ;;  %v463_v11 = vmul.f32 %v2027_v14, %v1932_v4  ;;  %v465_v47 = vmul.f32 %v2027_v14, %v1947_v16 }
 0x173   :  { %v464_v56 = vmul.f32 %v2029_v17, %v1975_v60  ;;  %v466_v33 = vmul.f32 %v2029_v17, %v1989_v18 }
 0x174   :  { %v2041_v45 = vperm.slane %v438_v41, 0  ;;  %v2043_v46 = vperm.slane %v438_v41, 1 }
 0x176   :  { %v2052_v0 = vadd.f32 %v2043_v46, %v470_v62  ;;  %v476_v49 = vadd.f32 %v2041_v45, %v439_v42  ;;  %v478_v27 = vadd.f32 %v2041_v45, %v441_v15  ;;  %v477_v51 = vadd.f32 %v2043_v46, %v440_v9 }
 0x177   :  { %v479_v52 = vadd.f32 %v2043_v46, %v442_v48  ;;  %v480_v2 = vadd.f32 %v2041_v45, %v443_v26  ;;  %v482_v32 = vadd.f32 %v2041_v45, %v445_v28  ;;  %v481_v7 = vadd.f32 %v2043_v46, %v444_v61 }
 0x178   :  { %v508_v53 = vmax.f32 %v476_v49, 0.0  ;;  %v510_v54 = vmax.f32 %v478_v27, 0.0  ;;  %v509_v30 = vmax.f32 %v477_v51, 0.0  ;;  %v483_v3 = vadd.f32 %v2043_v46, %v446_v63 }
 0x179   :  { %v511_v55 = vmax.f32 %v479_v52, 0.0  ;;  %v492_v10 = vadd.f32 %v2041_v45, %v455_v5  ;;  %v512_v13 = vmax.f32 %v480_v2, 0.0  ;;  %v494_v19 = vadd.f32 %v2041_v45, %v457_v6 }
 0x17a   :  { %v540_v59 = vpack.c.bf16 %v510_v54, %v508_v53  ;;  %v514_v44 = vmax.f32 %v482_v32, 0.0  ;;  %v493_v34 = vadd.f32 %v2043_v46, %v456_v40  ;;  %v495_v36 = vadd.f32 %v2043_v46, %v458_v29 }
 0x17b   :  { %v541_v1 = vpack.c.bf16 %v511_v55, %v509_v30  ;;  %v524_v62 = vmax.f32 %v492_v10, 0.0  ;;  %v513_v39 = vmax.f32 %v481_v7, 0.0  ;;  %v526_v4 = vmax.f32 %v494_v19, 0.0 }
 0x17c   :  { %692 = vmatmul.bf16.vlgmr.msrb.gmra.mxu2 %v540_v59  ;;  %v496_v38 = vadd.f32 %v2041_v45, %v459_v31  ;;  %v498_v16 = vadd.f32 %v2041_v45, %v461_v24  ;;  %v515_v41 = vmax.f32 %v483_v3, 0.0  ;;  %v525_v42 = vmax.f32 %v493_v34, 0.0 }
 0x17d   :  { %741 = vmatmul.bf16.vlgmr.msrb.gmra.mxu3 %v541_v1  ;;  %v527_v15 = vmax.f32 %v495_v36, 0.0  ;;  %v497_v60 = vadd.f32 %v2043_v46, %v460_v25  ;;  %v2101_v9 = vpack.c.bf16 %v526_v4, %v524_v62  ;;  %v499_v49 = vadd.f32 %v2043_v46, %v462_v8 }
 0x17e   :  { %v528_v18 = vmax.f32 %v496_v38, 0.0  ;;  %v530_v48 = vmax.f32 %v498_v16, 0.0  ;;  %v500_v52 = vadd.f32 %v2041_v45, %v463_v11  ;;  %v502_v53 = vadd.f32 %v2041_v45, %v465_v47 }
 0x17f   :  { %v2104_v27 = vpack.c.bf16 %v527_v15, %v525_v42  ;;  %v529_v51 = vmax.f32 %v497_v60, 0.0  ;;  %v531_v30 = vmax.f32 %v499_v49, 0.0  ;;  %v501_v55 = vadd.f32 %v2043_v46, %v464_v56 }
 0x180   :  { %v550_v54 = vpack.c.bf16 %v530_v48, %v528_v18  ;;  %v503_v26 = vadd.f32 %v2043_v46, %v466_v33  ;;  %v532_v59 = vmax.f32 %v500_v52, 0.0  ;;  %v534_v28 = vmax.f32 %v502_v53, 0.0 }
 0x181   :  { %v467_v61 = vmul.f32 %v2027_v14, %v1942_v12  ;;  %v469_v63 = vmul.f32 %v2027_v14, %v1956_v37  ;;  %v551_v1 = vpack.c.bf16 %v531_v30, %v529_v51  ;;  %v533_v2 = vmax.f32 %v501_v55, 0.0 }
 0x182   :  { %v535_v5 = vmax.f32 %v503_v26, 0.0  ;;  %v468_v6 = vmul.f32 %v2029_v17, %v2003_v57  ;;  %v552_v32 = vpack.c.bf16 %v534_v28, %v532_v59  ;;  %v539_v24 = vmax.f32 %v2052_v0, 0.0 }
 0x183   :  { %v504_v40 = vadd.f32 %v2041_v45, %v467_v61  ;;  %v506_v29 = vadd.f32 %v2041_v45, %v469_v63  ;;  %v542_v12 = vpack.c.bf16 %v514_v44, %v512_v13  ;;  %v543_v37 = vpack.c.bf16 %v515_v41, %v513_v39 }
 0x184   :  { %v553_v31 = vpack.c.bf16 %v535_v5, %v533_v2  ;;  %v505_v7 = vadd.f32 %v2043_v46, %v468_v6  ;;  %v447_v57 = vmul.f32 %v2027_v14, %v1857_v20  ;;  %v449_v47 = vmul.f32 %v2027_v14, %v1860_v21 }
 0x185   :  { %v536_v25 = vmax.f32 %v504_v40, 0.0  ;;  %v538_v8 = vmax.f32 %v506_v29, 0.0  ;;  %v448_v19 = vmul.f32 %v2029_v17, %v1890_v35  ;;  %v450_v0 = vmul.f32 %v2029_v17, %v1901_v43 }
 0x186   :  { %v537_v3 = vmax.f32 %v505_v7, 0.0  ;;  %v484_v13 = vadd.f32 %v2041_v45, %v447_v57  ;;  %v486_v56 = vadd.f32 %v2041_v45, %v449_v47  ;;  %v451_v35 = vmul.f32 %v2027_v14, %v1862_v22 }
 0x187   :  { %v554_v10 = vpack.c.bf16 %v538_v8, %v536_v25  ;;  %v485_v33 = vadd.f32 %v2043_v46, %v448_v19  ;;  %v487_v44 = vadd.f32 %v2043_v46, %v450_v0  ;;  %v453_v43 = vmul.f32 %v2027_v14, %v1865_v23 }
 0x188   :  { %v555_v11 = vpack.c.bf16 %v539_v24, %v537_v3  ;;  %v516_v62 = vmax.f32 %v484_v13, 0.0  ;;  %v518_v34 = vmax.f32 %v486_v56, 0.0  ;;  %v452_v4 = vmul.f32 %v2029_v17, %v1909_v50 }
 0x189   :  { %v517_v20 = vmax.f32 %v485_v33, 0.0  ;;  %v519_v36 = vmax.f32 %v487_v44, 0.0  ;;  %v454_v38 = vmul.f32 %v2029_v17, %v1919_v58  ;;  %v488_v16 = vadd.f32 %v2041_v45, %v451_v35 }
 0x18a   :  { %v544_v39 = vpack.c.bf16 %v518_v34, %v516_v62  ;;  %v490_v41 = vadd.f32 %v2041_v45, %v453_v43  ;;  %v489_v42 = vadd.f32 %v2043_v46, %v452_v4 }
 0x18b   :  { %v545_v21 = vpack.c.bf16 %v519_v36, %v517_v20  ;;  %v491_v15 = vadd.f32 %v2043_v46, %v454_v38  ;;  %v520_v60 = vmax.f32 %v488_v16, 0.0 }
 0x18c   :  { %697 = vmatmul.bf16.gmra.mxu2 %v542_v12  ;;  %v522_v18 = vmax.f32 %v490_v41, 0.0  ;;  %v521_v22 = vmax.f32 %v489_v42, 0.0 }
 0x18d   :  { %746 = vmatmul.bf16.gmra.mxu3 %v543_v37  ;;  %v523_v48 = vmax.f32 %v491_v15, 0.0 }
 0x18e   :  { %v546_v49 = vpack.c.bf16 %v522_v18, %v520_v60 }
 0x18f   :  { %v547_v23 = vpack.c.bf16 %v523_v48, %v521_v22 }
 0x19c   :  { %702 = vmatmul.bf16.gmra.mxu2 %v544_v39 }
 0x19d   :  { %751 = vmatmul.bf16.gmra.mxu3 %v545_v21 }
 0x1ac   :  { %707 = vmatmul.bf16.gmra.mxu2 %v546_v49 }
 0x1ad   :  { %756 = vmatmul.bf16.gmra.mxu3 %v547_v23 }
 0x1bc   :  { %712 = vmatmul.bf16.gmra.mxu2 %v2101_v9 }
 0x1bd   :  { %761 = vmatmul.bf16.gmra.mxu3 %v2104_v27 }
 0x1cc   :  { %717 = vmatmul.bf16.gmra.mxu2 %v550_v54 }
 0x1cd   :  { %766 = vmatmul.bf16.gmra.mxu3 %v551_v1 }
 0x1dc   :  { %722 = vmatmul.bf16.gmra.mxu2 %v552_v32 }
 0x1dd   :  { %771 = vmatmul.bf16.gmra.mxu3 %v553_v31 }
 0x1ec   :  { %727 = vmatmul.bf16.gmra.mxu2 %v554_v10 }
 0x1ed   :  { %776 = vmatmul.bf16.gmra.mxu3 %v555_v11 }
 0x1ff   :  { %v693_v50 = vpop.f32.mrf.mxu2 }
 0x200   :  { %v742_v58 = vpop.f32.mrf.mxu3 }
 0x201   :  { %v2146_v14 = vadd.f32 %v742_v58, %v693_v50 }
 0x203   :  { %v805_v25 = vmul.f32 %v2146_v14, %v2146_v14 }
 0x207   :  { %v695_v17 = vpop.f32.mrf.mxu2 }
 0x208   :  { %v744_v45 = vpop.f32.mrf.mxu3 }
 0x209   :  { %v2148_v46 = vadd.f32 %v744_v45, %v695_v17 }
 0x20b   :  { %v806_v12 = vmul.f32 %v2148_v46, %v2148_v46  ;;  %v784_v8 = vadd.f32 %v2148_v46, %v2146_v14 }
 0x20d   :  { %v821_v11 = vadd.f32 %v806_v12, %v805_v25 }
 0x20f   :  { %v698_v51 = vpop.f32.mrf.mxu2 }
 0x210   :  { %v747_v52 = vpop.f32.mrf.mxu3 }
 0x211   :  { %v2150_v53 = vadd.f32 %v747_v52, %v698_v51 }
 0x213   :  { %v807_v37 = vmul.f32 %v2150_v53, %v2150_v53  ;;  %v785_v57 = vadd.f32 %v784_v8, %v2150_v53 }
 0x215   :  { %v822_v0 = vadd.f32 %v821_v11, %v807_v37 }
 0x217   :  { %v700_v9 = vpop.f32.mrf.mxu2 }
 0x218   :  { %v749_v27 = vpop.f32.mrf.mxu3 }
 0x219   :  { %v2152_v54 = vadd.f32 %v749_v27, %v700_v9 }
 0x21b   :  { %v808_v47 = vmul.f32 %v2152_v54, %v2152_v54  ;;  %v786_v13 = vadd.f32 %v785_v57, %v2152_v54 }
 0x21d   :  { %v823_v44 = vadd.f32 %v822_v0, %v808_v47 }
 0x21f   :  { %v703_v30 = vpop.f32.mrf.mxu2 }
 0x220   :  { %v752_v55 = vpop.f32.mrf.mxu3 }
 0x221   :  { %v2154_v26 = vadd.f32 %v752_v55, %v703_v30 }
 0x223   :  { %v809_v56 = vmul.f32 %v2154_v26, %v2154_v26  ;;  %v787_v62 = vadd.f32 %v786_v13, %v2154_v26 }
 0x225   :  { %v824_v36 = vadd.f32 %v823_v44, %v809_v56 }
 0x227   :  { %v705_v59 = vpop.f32.mrf.mxu2 }
 0x228   :  { %v754_v28 = vpop.f32.mrf.mxu3 }
 0x229   :  { %v2167_v19 = vadd.f32 %v754_v28, %v705_v59 }
 0x22b   :  { %v810_v34 = vmul.f32 %v2167_v19, %v2167_v19  ;;  %v788_v39 = vadd.f32 %v787_v62, %v2167_v19 }
 0x22d   :  { %v825_v38 = vadd.f32 %v824_v36, %v810_v34 }
 0x22f   :  { %v708_v61 = vpop.f32.mrf.mxu2 }
 0x230   :  { %v757_v63 = vpop.f32.mrf.mxu3 }
 0x231   :  { %v2172_v33 = vadd.f32 %v757_v63, %v708_v61 }
 0x233   :  { %v811_v21 = vmul.f32 %v2172_v33, %v2172_v33  ;;  %v789_v16 = vadd.f32 %v788_v39, %v2172_v33 }
 0x235   :  { %v826_v15 = vadd.f32 %v825_v38, %v811_v21 }
 0x237   :  { %v710_v1 = vpop.f32.mrf.mxu2 }
 0x238   :  { %v759_v2 = vpop.f32.mrf.mxu3 }
 0x239   :  { %v2177_v20 = vadd.f32 %v759_v2, %v710_v1 }
 0x23b   :  { %v812_v41 = vmul.f32 %v2177_v20, %v2177_v20  ;;  %v790_v60 = vadd.f32 %v789_v16, %v2177_v20  ;;  %v1591_v16 = vld [vmem:[%s2300_s7 + $0x38] sm:$0xff] }
 0x23c   :  { %991 = vmatpush.bf16.msrb.mxu0 %v1591_v16 }
 0x23d   :  { %v827_v48 = vadd.f32 %v826_v15, %v812_v41  ;;  %v1590_v15 = vld [vmem:[%s2300_s7 + $0x30] sm:$0xff] }
 0x23f   :  { %v713_v5 = vpop.f32.mrf.mxu2 }
 0x240   :  { %v762_v6 = vpop.f32.mrf.mxu3  ;;  %992 = vmatpush.bf16.msrb.mxu0 %v1590_v15 }
 0x241   :  { %v2182_v35 = vadd.f32 %v762_v6, %v713_v5 }
 0x243   :  { %v813_v18 = vmul.f32 %v2182_v35, %v2182_v35  ;;  %v791_v49 = vadd.f32 %v790_v60, %v2182_v35 }
 0x245   :  { %v828_v58 = vadd.f32 %v827_v48, %v813_v18  ;;  %v1589_v48 = vld [vmem:[%s2300_s7 + $0x28] sm:$0xff] }
 0x246   :  { %993 = vmatpush.bf16.msrb.mxu0 %v1589_v48 }
 0x247   :  { %v715_v32 = vpop.f32.mrf.mxu2 }
 0x248   :  { %v764_v40 = vpop.f32.mrf.mxu3 }
 0x249   :  { %v2187_v42 = vadd.f32 %v764_v40, %v715_v32 }
 0x24b   :  { %v814_v23 = vmul.f32 %v2187_v42, %v2187_v42  ;;  %v792_v17 = vadd.f32 %v791_v49, %v2187_v42  ;;  %v1588_v49 = vld [vmem:[%s2300_s7 + $0x20] sm:$0xff] }
 0x24c   :  { %994 = vmatpush.bf16.msrb.mxu0 %v1588_v49 }
 0x24d   :  { %v829_v27 = vadd.f32 %v828_v58, %v814_v23  ;;  %v1587_v58 = vld [vmem:[%s2300_s7 + $0x18] sm:$0xff] }
 0x24f   :  { %v718_v29 = vpop.f32.mrf.mxu2 }
 0x250   :  { %v767_v31 = vpop.f32.mrf.mxu3  ;;  %995 = vmatpush.bf16.msrb.mxu0 %v1587_v58 }
 0x251   :  { %v2192_v22 = vadd.f32 %v767_v31, %v718_v29 }
 0x253   :  { %v815_v45 = vmul.f32 %v2192_v22, %v2192_v22  ;;  %v793_v30 = vadd.f32 %v792_v17, %v2192_v22 }
 0x255   :  { %v830_v28 = vadd.f32 %v829_v27, %v815_v45 }
 0x257   :  { %v720_v7 = vpop.f32.mrf.mxu2 }
 0x258   :  { %v769_v24 = vpop.f32.mrf.mxu3 }
 0x259   :  { %v2197_v50 = vadd.f32 %v769_v24, %v720_v7 }
 0x25b   :  { %v816_v55 = vmul.f32 %v2197_v50, %v2197_v50  ;;  %v794_v61 = vadd.f32 %v793_v30, %v2197_v50  ;;  %v1585_v30 = vld [vmem:[%s2300_s7 + $0x8] sm:$0xff] }
 0x25d   :  { %v831_v2 = vadd.f32 %v830_v28, %v816_v55  ;;  %v782_v55 = vld [vmem:[%s2298_s5] sm:$0x1] }
 0x25f   :  { %v723_v3 = vpop.f32.mrf.mxu2 }
 0x260   :  { %v772_v10 = vpop.f32.mrf.mxu3 }
 0x261   :  { %v2202_v51 = vadd.f32 %v772_v10, %v723_v3 }
 0x263   :  { %v817_v63 = vmul.f32 %v2202_v51, %v2202_v51  ;;  %v795_v5 = vadd.f32 %v794_v61, %v2202_v51 }
 0x265   :  { %v832_v32 = vadd.f32 %v831_v2, %v817_v63  ;;  %v1584_v2 = vld [vmem:[%s2300_s7] sm:$0xff] }
 0x267   :  { %v725_v43 = vpop.f32.mrf.mxu2 }
 0x268   :  { %v774_v4 = vpop.f32.mrf.mxu3 }
 0x269   :  { %v2207_v59 = vadd.f32 %v774_v4, %v725_v43 }
 0x26b   :  { %v818_v6 = vmul.f32 %v2207_v59, %v2207_v59  ;;  %v796_v40 = vadd.f32 %v795_v5, %v2207_v59  ;;  %v783_v5 = vld [vmem:[%s2299_s6] sm:$0x1] }
 0x26d   :  { %v833_v24 = vadd.f32 %v832_v32, %v818_v6 }
 0x26f   :  { %v728_v52 = vpop.f32.mrf.mxu2 }
 0x270   :  { %v777_v9 = vpop.f32.mrf.mxu3 }
 0x271   :  { %v2212_v1 = vadd.f32 %v777_v9, %v728_v52  ;;  %v1586_v52 = vld [vmem:[%s2300_s7 + $0x10] sm:$0xff]  ;;  %s1760_s7 = smov [#allocation7]  }
 0x272   :  { %996 = vmatpush.bf16.msrb.mxu0 %v1586_v52 }
 0x273   :  { %v819_v29 = vmul.f32 %v2212_v1, %v2212_v1  ;;  %v797_v12 = vadd.f32 %v796_v40, %v2212_v1 }
 0x275   :  { %v834_v8 = vadd.f32 %v833_v24, %v819_v29 }
 0x276   :  { %997 = vmatpush.bf16.msrb.mxu0 %v1585_v30 }
 0x277   :  { %v730_v31 = vpop.f32.mrf.mxu2 }
 0x278   :  { %v779_v7 = vpop.f32.mrf.mxu3 }
 0x279   :  { %v780_v25 = vadd.f32 %v779_v7, %v730_v31 }
 0x27a   :  { %998 = vmatpush.bf16.msrb.mxu0 %v1584_v2 }
 0x27b   :  { %v798_v37 = vadd.f32 %v797_v12, %v780_v25  ;;  %v820_v3 = vmul.f32 %v780_v25, %v780_v25 }
 0x27d   :  { %v799_v10 = vrot.slane %v798_v37, 4  ;;  %v835_v11 = vadd.f32 %v834_v8, %v820_v3 }
 0x27f   :  { %v800_v57 = vadd.f32 %v799_v10, %v798_v37  ;;  %v836_v47 = vrot.slane %v835_v11, 4 }
 0x281   :  { %v801_v0 = vrot.slane %v800_v57, 2  ;;  %v837_v13 = vadd.f32 %v836_v47, %v835_v11 }
 0x283   :  { %v802_v56 = vadd.f32 %v801_v0, %v800_v57  ;;  %v838_v44 = vrot.slane %v837_v13, 2 }
 0x285   :  { %v803_v62 = vrot.slane %v802_v56, 1  ;;  %v839_v34 = vadd.f32 %v838_v44, %v837_v13 }
 0x287   :  { %v804_v36 = vadd.f32 %v803_v62, %v802_v56  ;;  %v840_v39 = vrot.slane %v839_v34, 1 }
 0x289   :  { %v841_v21 = vadd.f32 %v840_v39, %v839_v34  ;;  %v842_v43 = vmul.f32 0.0078125, %v804_v36 }
 0x28b   :  { %v843_v4 = vmul.f32 0.0078125, %v841_v21  ;;  %v844_v38 = vmul.f32 %v842_v43, %v842_v43 }
 0x28d   :  { %v845_v41 = vsub.f32 %v843_v4, %v844_v38 }
 0x28f   :  { %v846_v60 = vmax.f32 %v845_v41, 0.0 }
 0x291   :  { %v847_v18 = vadd.f32 1e-05, %v846_v60 }
 0x293   :  { %1610 = vrsqrt.f32 %v847_v18  ;;  %vm854_vm9 = vweird.f32 %v847_v18 }
 0x299   :  { %v1611_v23 = vpop.eup %1610 }
 0x29a   :  { %v849_v17 = vmul.f32 %v1611_v23, %v847_v18  ;;  %vm855_vm8 = vweird.f32 %v1611_v23 }
 0x29b   :  { %vm856_vm10 = vmor %vm854_vm9, %vm855_vm8 }
 0x29c   :  { %v850_v45 = vmul.f32 %v1611_v23, %v849_v17 }
 0x29e   :  { %v851_v9 = vmul.f32 0.5, %v850_v45 }
 0x2a0   :  { %v852_v27 = vsub.f32 1.5, %v851_v9 }
 0x2a2   :  { %v853_v28 = vmul.f32 %v1611_v23, %v852_v27 }
 0x2a4   :  { %v857_v61 = vsel %vm856_vm10, %v1611_v23, %v853_v28 }
 0x2a5   :  { %v858_v63 = vmul.f32 %v857_v61, %v782_v55 }
 0x2a7   :  { %v859_v6 = vmul.f32 %v858_v63, %v842_v43  ;;  %v862_v32 = vperm.slane %v858_v63, 0 }
 0x2a9   :  { %v860_v40 = vsub.f32 %v783_v5, %v859_v6  ;;  %v879_v29 = vmul.f32 %v862_v32, %v780_v25  ;;  %v864_v7 = vmul.f32 %v862_v32, %v2146_v14  ;;  %v865_v24 = vmul.f32 %v862_v32, %v2148_v46 }
 0x2aa   :  { %v872_v10 = vmul.f32 %v862_v32, %v2182_v35  ;;  %v873_v11 = vmul.f32 %v862_v32, %v2187_v42  ;;  %v874_v57 = vmul.f32 %v862_v32, %v2192_v22  ;;  %v875_v47 = vmul.f32 %v862_v32, %v2197_v50 }
 0x2ab   :  { %v881_v31 = vperm.slane %v860_v40, 0  ;;  %v876_v56 = vmul.f32 %v862_v32, %v2202_v51  ;;  %v877_v34 = vmul.f32 %v862_v32, %v2207_v59  ;;  %v878_v42 = vmul.f32 %v862_v32, %v2212_v1 }
 0x2ac   :  { %v866_v51 = vmul.f32 %v862_v32, %v2150_v53  ;;  %v867_v41 = vmul.f32 %v862_v32, %v2152_v54  ;;  %v868_v17 = vmul.f32 %v862_v32, %v2154_v26  ;;  %v869_v45 = vmul.f32 %v862_v32, %v2167_v19  ;;  %v2269_v26 = vld [vmem:[%s2301_s8] ss:$0 sm:$0xff]  ;;  %s1364_s8 = sshll.u32 %s1760_s7, 4  ;;  %s1365_s8 = int_to_ptr.vmem [resolvable:$true] %s1364_s8 }
 0x2ad   :  { %v883_v12 = vadd.f32 %v881_v31, %v864_v7  ;;  %v884_v8 = vadd.f32 %v881_v31, %v865_v24  ;;  %v891_v25 = vadd.f32 %v881_v31, %v872_v10  ;;  %v892_v13 = vadd.f32 %v881_v31, %v873_v11 }
 0x2ae   :  { %v893_v14 = vadd.f32 %v881_v31, %v874_v57  ;;  %v894_v44 = vadd.f32 %v881_v31, %v875_v47  ;;  %v895_v36 = vadd.f32 %v881_v31, %v876_v56  ;;  %v898_v22 = vadd.f32 %v881_v31, %v879_v29 }
 0x2af   :  { %v899_v37 = vmax.f32 %v883_v12, 0.0  ;;  %v900_v3 = vmax.f32 %v884_v8, 0.0  ;;  %v907_v46 = vmax.f32 %v891_v25, 0.0  ;;  %v908_v62 = vmax.f32 %v892_v13, 0.0 }
 0x2b0   :  { %v909_v35 = vmax.f32 %v893_v14, 0.0  ;;  %v910_v39 = vmax.f32 %v894_v44, 0.0  ;;  %v896_v50 = vadd.f32 %v881_v31, %v877_v34  ;;  %v911_v43 = vmax.f32 %v895_v36, 0.0 }
 0x2b1   :  { %v915_v0 = vpack.c.bf16 %v900_v3, %v899_v37  ;;  %v919_v21 = vpack.c.bf16 %v908_v62, %v907_v46  ;;  %v897_v38 = vadd.f32 %v881_v31, %v878_v42  ;;  %v914_v16 = vmax.f32 %v898_v22, 0.0 }
 0x2b2   :  { %v920_v4 = vpack.c.bf16 %v910_v39, %v909_v35  ;;  %v912_v15 = vmax.f32 %v896_v50, 0.0  ;;  %v885_v18 = vadd.f32 %v881_v31, %v866_v51  ;;  %v886_v59 = vadd.f32 %v881_v31, %v867_v41 }
 0x2b3   :  { %999 = vmatmul.bf16.vlgmr.msrb.gmra.mxu0 %v915_v0  ;;  %v913_v60 = vmax.f32 %v897_v38, 0.0  ;;  %v887_v52 = vadd.f32 %v881_v31, %v868_v17  ;;  %v888_v9 = vadd.f32 %v881_v31, %v869_v45  ;;  %v870_v54 = vmul.f32 %v862_v32, %v2172_v33 }
 0x2b4   :  { %v921_v48 = vpack.c.bf16 %v912_v15, %v911_v43  ;;  %v901_v23 = vmax.f32 %v885_v18, 0.0  ;;  %v902_v58 = vmax.f32 %v886_v59, 0.0  ;;  %v871_v55 = vmul.f32 %v862_v32, %v2177_v20 }
 0x2b5   :  { %v922_v49 = vpack.c.bf16 %v914_v16, %v913_v60  ;;  %v903_v27 = vmax.f32 %v887_v52, 0.0  ;;  %v904_v53 = vmax.f32 %v888_v9, 0.0  ;;  %v889_v28 = vadd.f32 %v881_v31, %v870_v54 }
 0x2b6   :  { %v916_v1 = vpack.c.bf16 %v902_v58, %v901_v23  ;;  %v890_v61 = vadd.f32 %v881_v31, %v871_v55 }
 0x2b7   :  { %v917_v30 = vpack.c.bf16 %v904_v53, %v903_v27  ;;  %v905_v63 = vmax.f32 %v889_v28, 0.0 }
 0x2b8   :  { %v906_v2 = vmax.f32 %v890_v61, 0.0 }
 0x2ba   :  { %v918_v5 = vpack.c.bf16 %v906_v2, %v905_v63 }
 0x2c3   :  { %1004 = vmatmul.bf16.gmra.mxu0 %v916_v1 }
 0x2d3   :  { %1009 = vmatmul.bf16.gmra.mxu0 %v917_v30 }
 0x2e3   :  { %1014 = vmatmul.bf16.gmra.mxu0 %v918_v5 }
 0x2f3   :  { %1019 = vmatmul.bf16.gmra.mxu0 %v919_v21 }
 0x303   :  { %1024 = vmatmul.bf16.gmra.mxu0 %v920_v4 }
 0x313   :  { %1029 = vmatmul.bf16.gmra.mxu0 %v921_v48 }
 0x323   :  { %1034 = vmatmul.bf16.gmra.mxu0 %v922_v49 }
 0x330   :  { %v1000_v19 = vpop.f32.mrf.mxu0 }
 0x331   :  { %v1001_v33 = vadd.f32 %v2269_v26, %v1000_v19 }
 0x333   :  { %v1540_v6 = vmul.f32 -1.442695, %v1001_v33 }
 0x335   :  { %1612 = vpow2.f32 %v1540_v6 }
 0x338   :  { %v1002_v20 = vpop.f32.mrf.mxu0 }
 0x339   :  { %v1003_v32 = vadd.f32 %v2269_v26, %v1002_v20 }
 0x33b   :  { %v1613_v40 = vpop.eup %1612  ;;  %v1541_v29 = vmul.f32 -1.442695, %v1003_v32 }
 0x33c   :  { %v1088_v31 = vadd.f32 1.0, %v1613_v40 }
 0x33d   :  { %1614 = vpow2.f32 %v1541_v29 }
 0x33e   :  { %1616 = vrcp.f32 %v1088_v31  ;;  %v1115_v57 = vand.u32 2147483648, %v1088_v31  ;;  %v1113_v25 = vand.u32 2147483647, %v1088_v31  ;;  %vm1109_vm12 = vweird.f32 %v1088_v31 }
 0x340   :  { %v1005_v7 = vpop.f32.mrf.mxu0  ;;  %v1116_v62 = vor.u32 1.1754944e-38, %v1115_v57  ;;  %vm1114_vm14 = vcmp.eq.f32.partialorder %v1113_v25, 8.507059e+37 }
 0x341   :  { %v1006_v24 = vadd.f32 %v2269_v26, %v1005_v7 }
 0x343   :  { %v1615_v12 = vpop.eup %1614  ;;  %v1542_v8 = vmul.f32 -1.442695, %v1006_v24 }
 0x344   :  { %v1617_v37 = vpop.eup %1616  ;;  %v1089_v3 = vadd.f32 1.0, %v1615_v12 }
 0x345   :  { %v1105_v10 = vmul.f32 %v1617_v37, %v1088_v31  ;;  %1618 = vpow2.f32 %v1542_v8  ;;  %vm1110_vm11 = vweird.f32 %v1617_v37 }
 0x346   :  { %1620 = vrcp.f32 %v1089_v3  ;;  %vm1111_vm13 = vmor %vm1109_vm12, %vm1110_vm11  ;;  %v1130_v22 = vand.u32 2147483648, %v1089_v3  ;;  %v1128_v43 = vand.u32 2147483647, %v1089_v3  ;;  %vm1124_vm0 = vweird.f32 %v1089_v3 }
 0x347   :  { %v1106_v11 = vsub.f32 1.0, %v1105_v10 }
 0x348   :  { %v1007_v47 = vpop.f32.mrf.mxu0  ;;  %v1131_v15 = vor.u32 1.1754944e-38, %v1130_v22  ;;  %vm1129_vm2 = vcmp.eq.f32.partialorder %v1128_v43, 8.507059e+37 }
 0x349   :  { %v1107_v0 = vmul.f32 %v1617_v37, %v1106_v11  ;;  %v1008_v13 = vadd.f32 %v2269_v26, %v1007_v47 }
 0x34b   :  { %v1619_v56 = vpop.eup %1618  ;;  %v1108_v14 = vadd.f32 %v1617_v37, %v1107_v0  ;;  %v1543_v44 = vmul.f32 -1.442695, %v1008_v13 }
 0x34c   :  { %v1621_v46 = vpop.eup %1620  ;;  %v1090_v34 = vadd.f32 1.0, %v1619_v56 }
 0x34d   :  { %v1112_v36 = vsel %vm1111_vm13, %v1617_v37, %v1108_v14  ;;  %v1120_v35 = vmul.f32 %v1621_v46, %v1089_v3  ;;  %1622 = vpow2.f32 %v1543_v44  ;;  %vm1125_vm15 = vweird.f32 %v1621_v46 }
 0x34e   :  { %v1117_v39 = vsel %vm1114_vm14, %v1116_v62, %v1112_v36  ;;  %1624 = vrcp.f32 %v1090_v34  ;;  %vm1126_vm1 = vmor %vm1124_vm0, %vm1125_vm15  ;;  %v1145_v23 = vand.u32 2147483648, %v1090_v34  ;;  %v1143_v17 = vand.u32 2147483647, %v1090_v34 }
 0x34f   :  { %1344 = vst [vmem:[#allocation7] sm:$0xff] %v1117_v39  ;;  %v1121_v42 = vsub.f32 1.0, %v1120_v35  ;;  %vm1139_vm4 = vweird.f32 %v1090_v34 }
 0x350   :  { %v1010_v21 = vpop.f32.mrf.mxu0  ;;  %v1146_v30 = vor.u32 1.1754944e-38, %v1145_v23  ;;  %vm1144_vm6 = vcmp.eq.f32.partialorder %v1143_v17, 8.507059e+37 }
 0x351   :  { %v1122_v50 = vmul.f32 %v1621_v46, %v1121_v42  ;;  %v1011_v4 = vadd.f32 %v2269_v26, %v1010_v21 }
 0x353   :  { %v1623_v38 = vpop.eup %1622  ;;  %v1123_v16 = vadd.f32 %v1621_v46, %v1122_v50  ;;  %v1544_v51 = vmul.f32 -1.442695, %v1011_v4 }
 0x354   :  { %v1625_v41 = vpop.eup %1624  ;;  %v1091_v60 = vadd.f32 1.0, %v1623_v38 }
 0x355   :  { %v1127_v18 = vsel %vm1126_vm1, %v1621_v46, %v1123_v16  ;;  %v1135_v59 = vmul.f32 %v1625_v41, %v1090_v34  ;;  %1626 = vpow2.f32 %v1544_v51  ;;  %vm1140_vm3 = vweird.f32 %v1625_v41 }
 0x356   :  { %v1132_v48 = vsel %vm1129_vm2, %v1131_v15, %v1127_v18  ;;  %1628 = vrcp.f32 %v1091_v60  ;;  %vm1141_vm5 = vmor %vm1139_vm4, %vm1140_vm3  ;;  %v1160_v2 = vand.u32 2147483648, %v1091_v60  ;;  %v1158_v33 = vand.u32 2147483647, %v1091_v60 }
 0x357   :  { %1345 = vst [vmem:[#allocation7 + $0x8] sm:$0xff] %v1132_v48  ;;  %v1136_v49 = vsub.f32 1.0, %v1135_v59  ;;  %vm1154_vm8 = vweird.f32 %v1091_v60 }
 0x358   :  { %v1012_v58 = vpop.f32.mrf.mxu0  ;;  %v1161_v31 = vor.u32 1.1754944e-38, %v1160_v2  ;;  %vm1159_vm10 = vcmp.eq.f32.partialorder %v1158_v33, 8.507059e+37 }
 0x359   :  { %v1137_v1 = vmul.f32 %v1625_v41, %v1136_v49  ;;  %v1013_v45 = vadd.f32 %v2269_v26, %v1012_v58 }
 0x35b   :  { %v1627_v52 = vpop.eup %1626  ;;  %v1138_v9 = vadd.f32 %v1625_v41, %v1137_v1  ;;  %v1545_v27 = vmul.f32 -1.442695, %v1013_v45 }
 0x35c   :  { %v1629_v53 = vpop.eup %1628  ;;  %v1092_v54 = vadd.f32 1.0, %v1627_v52 }
 0x35d   :  { %v1142_v55 = vsel %vm1141_vm5, %v1625_v41, %v1138_v9  ;;  %v1150_v28 = vmul.f32 %v1629_v53, %v1091_v60  ;;  %1630 = vpow2.f32 %v1545_v27  ;;  %vm1155_vm7 = vweird.f32 %v1629_v53 }
 0x35e   :  { %v1147_v61 = vsel %vm1144_vm6, %v1146_v30, %v1142_v55  ;;  %1632 = vrcp.f32 %v1092_v54  ;;  %vm1156_vm9 = vmor %vm1154_vm8, %vm1155_vm7  ;;  %v1175_v3 = vand.u32 2147483648, %v1092_v54  ;;  %v1173_v57 = vand.u32 2147483647, %v1092_v54 }
 0x35f   :  { %1346 = vst [vmem:[#allocation7 + $0x10] sm:$0xff] %v1147_v61  ;;  %v1151_v63 = vsub.f32 1.0, %v1150_v28  ;;  %vm1169_vm12 = vweird.f32 %v1092_v54 }
 0x360   :  { %v1015_v5 = vpop.f32.mrf.mxu0  ;;  %v1176_v14 = vor.u32 1.1754944e-38, %v1175_v3  ;;  %vm1174_vm14 = vcmp.eq.f32.partialorder %v1173_v57, 8.507059e+37 }
 0x361   :  { %v1152_v19 = vmul.f32 %v1629_v53, %v1151_v63  ;;  %v1016_v6 = vadd.f32 %v2269_v26, %v1015_v5 }
 0x363   :  { %v1631_v20 = vpop.eup %1630  ;;  %v1153_v32 = vadd.f32 %v1629_v53, %v1152_v19  ;;  %v1546_v40 = vmul.f32 -1.442695, %v1016_v6 }
 0x364   :  { %v1633_v29 = vpop.eup %1632  ;;  %v1093_v7 = vadd.f32 1.0, %v1631_v20 }
 0x365   :  { %v1157_v24 = vsel %vm1156_vm9, %v1629_v53, %v1153_v32  ;;  %v1165_v12 = vmul.f32 %v1633_v29, %v1092_v54  ;;  %1634 = vpow2.f32 %v1546_v40  ;;  %vm1170_vm11 = vweird.f32 %v1633_v29 }
 0x366   :  { %v1162_v8 = vsel %vm1159_vm10, %v1161_v31, %v1157_v24  ;;  %1636 = vrcp.f32 %v1093_v7  ;;  %vm1171_vm13 = vmor %vm1169_vm12, %vm1170_vm11  ;;  %v1190_v35 = vand.u32 2147483648, %v1093_v7  ;;  %v1188_v22 = vand.u32 2147483647, %v1093_v7 }
 0x367   :  { %1347 = vst [vmem:[#allocation7 + $0x18] sm:$0xff] %v1162_v8  ;;  %v1166_v37 = vsub.f32 1.0, %v1165_v12  ;;  %vm1184_vm0 = vweird.f32 %v1093_v7 }
 0x368   :  { %v1017_v10 = vpop.f32.mrf.mxu0  ;;  %v1191_v16 = vor.u32 1.1754944e-38, %v1190_v35  ;;  %vm1189_vm2 = vcmp.eq.f32.partialorder %v1188_v22, 8.507059e+37 }
 0x369   :  { %v1167_v11 = vmul.f32 %v1633_v29, %v1166_v37  ;;  %v1018_v47 = vadd.f32 %v2269_v26, %v1017_v10 }
 0x36b   :  { %v1635_v0 = vpop.eup %1634  ;;  %v1168_v25 = vadd.f32 %v1633_v29, %v1167_v11  ;;  %v1547_v13 = vmul.f32 -1.442695, %v1018_v47 }
 0x36c   :  { %v1637_v56 = vpop.eup %1636  ;;  %v1094_v44 = vadd.f32 1.0, %v1635_v0 }
 0x36d   :  { %v1172_v46 = vsel %vm1171_vm13, %v1633_v29, %v1168_v25  ;;  %v1180_v62 = vmul.f32 %v1637_v56, %v1093_v7  ;;  %1638 = vpow2.f32 %v1547_v13  ;;  %vm1185_vm15 = vweird.f32 %v1637_v56 }
 0x36e   :  { %v1177_v34 = vsel %vm1174_vm14, %v1176_v14, %v1172_v46  ;;  %1640 = vrcp.f32 %v1094_v44  ;;  %vm1186_vm1 = vmor %vm1184_vm0, %vm1185_vm15  ;;  %v1205_v59 = vand.u32 2147483648, %v1094_v44  ;;  %v1203_v23 = vand.u32 2147483647, %v1094_v44 }
 0x36f   :  { %1348 = vst [vmem:[#allocation7 + $0x20] sm:$0xff] %v1177_v34  ;;  %v1181_v36 = vsub.f32 1.0, %v1180_v62  ;;  %vm1199_vm4 = vweird.f32 %v1094_v44 }
 0x370   :  { %v1020_v39 = vpop.f32.mrf.mxu0  ;;  %v1206_v9 = vor.u32 1.1754944e-38, %v1205_v59  ;;  %vm1204_vm6 = vcmp.eq.f32.partialorder %v1203_v23, 8.507059e+37 }
 0x371   :  { %v1182_v42 = vmul.f32 %v1637_v56, %v1181_v36  ;;  %v1021_v21 = vadd.f32 %v2269_v26, %v1020_v39 }
 0x373   :  { %v1639_v50 = vpop.eup %1638  ;;  %v1183_v43 = vadd.f32 %v1637_v56, %v1182_v42  ;;  %v1548_v4 = vmul.f32 -1.442695, %v1021_v21 }
 0x374   :  { %v1641_v38 = vpop.eup %1640  ;;  %v1095_v51 = vadd.f32 1.0, %v1639_v50 }
 0x375   :  { %v1187_v41 = vsel %vm1186_vm1, %v1637_v56, %v1183_v43  ;;  %v1195_v15 = vmul.f32 %v1641_v38, %v1094_v44  ;;  %1642 = vpow2.f32 %v1548_v4  ;;  %vm1200_vm3 = vweird.f32 %v1641_v38 }
 0x376   :  { %v1192_v60 = vsel %vm1189_vm2, %v1191_v16, %v1187_v41  ;;  %1644 = vrcp.f32 %v1095_v51  ;;  %vm1201_vm5 = vmor %vm1199_vm4, %vm1200_vm3  ;;  %v1220_v28 = vand.u32 2147483648, %v1095_v51  ;;  %v1218_v2 = vand.u32 2147483647, %v1095_v51 }
 0x377   :  { %1349 = vst [vmem:[#allocation7 + $0x28] sm:$0xff] %v1192_v60  ;;  %v1196_v18 = vsub.f32 1.0, %v1195_v15  ;;  %vm1214_vm8 = vweird.f32 %v1095_v51 }
 0x378   :  { %v1022_v48 = vpop.f32.mrf.mxu0  ;;  %v1221_v32 = vor.u32 1.1754944e-38, %v1220_v28  ;;  %vm1219_vm10 = vcmp.eq.f32.partialorder %v1218_v2, 8.507059e+37 }
 0x379   :  { %v1197_v49 = vmul.f32 %v1641_v38, %v1196_v18  ;;  %v1023_v58 = vadd.f32 %v2269_v26, %v1022_v48 }
 0x37b   :  { %v1643_v1 = vpop.eup %1642  ;;  %v1198_v17 = vadd.f32 %v1641_v38, %v1197_v49  ;;  %v1549_v45 = vmul.f32 -1.442695, %v1023_v58 }
 0x37c   :  { %v1645_v52 = vpop.eup %1644  ;;  %v1096_v27 = vadd.f32 1.0, %v1643_v1 }
 0x37d   :  { %v1202_v53 = vsel %vm1201_vm5, %v1641_v38, %v1198_v17  ;;  %v1210_v30 = vmul.f32 %v1645_v52, %v1095_v51  ;;  %1646 = vpow2.f32 %v1549_v45  ;;  %vm1215_vm7 = vweird.f32 %v1645_v52 }
 0x37e   :  { %v1207_v54 = vsel %vm1204_vm6, %v1206_v9, %v1202_v53  ;;  %1648 = vrcp.f32 %v1096_v27  ;;  %vm1216_vm9 = vmor %vm1214_vm8, %vm1215_vm7  ;;  %v1235_v12 = vand.u32 2147483648, %v1096_v27  ;;  %v1233_v3 = vand.u32 2147483647, %v1096_v27 }
 0x37f   :  { %1350 = vst [vmem:[#allocation7 + $0x30] sm:$0xff] %v1207_v54  ;;  %v1211_v55 = vsub.f32 1.0, %v1210_v30  ;;  %vm1229_vm12 = vweird.f32 %v1096_v27 }
 0x380   :  { %v1025_v61 = vpop.f32.mrf.mxu0  ;;  %v1236_v25 = vor.u32 1.1754944e-38, %v1235_v12  ;;  %vm1234_vm14 = vcmp.eq.f32.partialorder %v1233_v3, 8.507059e+37 }
 0x381   :  { %v1212_v63 = vmul.f32 %v1645_v52, %v1211_v55  ;;  %v1026_v5 = vadd.f32 %v2269_v26, %v1025_v61 }
 0x383   :  { %v1647_v19 = vpop.eup %1646  ;;  %v1213_v33 = vadd.f32 %v1645_v52, %v1212_v63  ;;  %v1550_v6 = vmul.f32 -1.442695, %v1026_v5 }
 0x384   :  { %v1649_v20 = vpop.eup %1648  ;;  %v1097_v40 = vadd.f32 1.0, %v1647_v19 }
 0x385   :  { %v1217_v29 = vsel %vm1216_vm9, %v1645_v52, %v1213_v33  ;;  %v1225_v31 = vmul.f32 %v1649_v20, %v1096_v27  ;;  %1650 = vpow2.f32 %v1550_v6  ;;  %vm1230_vm11 = vweird.f32 %v1649_v20 }
 0x386   :  { %v1222_v7 = vsel %vm1219_vm10, %v1221_v32, %v1217_v29  ;;  %1652 = vrcp.f32 %v1097_v40  ;;  %vm1231_vm13 = vmor %vm1229_vm12, %vm1230_vm11  ;;  %v1250_v62 = vand.u32 2147483648, %v1097_v40  ;;  %v1248_v35 = vand.u32 2147483647, %v1097_v40 }
 0x387   :  { %1351 = vst [vmem:[#allocation7 + $0x38] sm:$0xff] %v1222_v7  ;;  %v1226_v24 = vsub.f32 1.0, %v1225_v31  ;;  %vm1244_vm0 = vweird.f32 %v1097_v40 }
 0x388   :  { %v1027_v8 = vpop.f32.mrf.mxu0  ;;  %v1251_v43 = vor.u32 1.1754944e-38, %v1250_v62  ;;  %vm1249_vm2 = vcmp.eq.f32.partialorder %v1248_v35, 8.507059e+37 }
 0x389   :  { %v1227_v37 = vmul.f32 %v1649_v20, %v1226_v24  ;;  %v1028_v10 = vadd.f32 %v2269_v26, %v1027_v8 }
 0x38b   :  { %v1651_v11 = vpop.eup %1650  ;;  %v1228_v57 = vadd.f32 %v1649_v20, %v1227_v37  ;;  %v1551_v47 = vmul.f32 -1.442695, %v1028_v10 }
 0x38c   :  { %v1653_v0 = vpop.eup %1652  ;;  %v1098_v13 = vadd.f32 1.0, %v1651_v11 }
 0x38d   :  { %v1232_v56 = vsel %vm1231_vm13, %v1649_v20, %v1228_v57  ;;  %v1240_v14 = vmul.f32 %v1653_v0, %v1097_v40  ;;  %1654 = vpow2.f32 %v1551_v47  ;;  %vm1245_vm15 = vweird.f32 %v1653_v0 }
 0x38e   :  { %v1237_v44 = vsel %vm1234_vm14, %v1236_v25, %v1232_v56  ;;  %1656 = vrcp.f32 %v1098_v13  ;;  %vm1246_vm1 = vmor %vm1244_vm0, %vm1245_vm15  ;;  %v1265_v15 = vand.u32 2147483648, %v1098_v13  ;;  %v1263_v59 = vand.u32 2147483647, %v1098_v13 }
 0x38f   :  { %1352 = vst [vmem:[#allocation7 + $0x40] sm:$0xff] %v1237_v44  ;;  %v1241_v46 = vsub.f32 1.0, %v1240_v14  ;;  %vm1259_vm4 = vweird.f32 %v1098_v13 }
 0x390   :  { %v1030_v34 = vpop.f32.mrf.mxu0  ;;  %v1266_v17 = vor.u32 1.1754944e-38, %v1265_v15  ;;  %vm1264_vm6 = vcmp.eq.f32.partialorder %v1263_v59, 8.507059e+37 }
 0x391   :  { %v1242_v36 = vmul.f32 %v1653_v0, %v1241_v46  ;;  %v1031_v39 = vadd.f32 %v2269_v26, %v1030_v34 }
 0x393   :  { %v1655_v42 = vpop.eup %1654  ;;  %v1243_v22 = vadd.f32 %v1653_v0, %v1242_v36  ;;  %v1552_v21 = vmul.f32 -1.442695, %v1031_v39 }
 0x394   :  { %v1657_v50 = vpop.eup %1656  ;;  %v1099_v4 = vadd.f32 1.0, %v1655_v42 }
 0x395   :  { %v1247_v38 = vsel %vm1246_vm1, %v1653_v0, %v1243_v22  ;;  %v1255_v16 = vmul.f32 %v1657_v50, %v1098_v13  ;;  %1658 = vpow2.f32 %v1552_v21  ;;  %vm1260_vm3 = vweird.f32 %v1657_v50 }
 0x396   :  { %v1252_v51 = vsel %vm1249_vm2, %v1251_v43, %v1247_v38  ;;  %1660 = vrcp.f32 %v1099_v4  ;;  %vm1261_vm5 = vmor %vm1259_vm4, %vm1260_vm3  ;;  %v1280_v30 = vand.u32 2147483648, %v1099_v4  ;;  %v1278_v28 = vand.u32 2147483647, %v1099_v4 }
 0x397   :  { %1353 = vst [vmem:[#allocation7 + $0x48] sm:$0xff] %v1252_v51  ;;  %v1256_v41 = vsub.f32 1.0, %v1255_v16  ;;  %vm1274_vm8 = vweird.f32 %v1099_v4 }
 0x398   :  { %v1032_v60 = vpop.f32.mrf.mxu0  ;;  %v1281_v33 = vor.u32 1.1754944e-38, %v1280_v30  ;;  %vm1279_vm10 = vcmp.eq.f32.partialorder %v1278_v28, 8.507059e+37 }
 0x399   :  { %v1257_v18 = vmul.f32 %v1657_v50, %v1256_v41  ;;  %v1033_v48 = vadd.f32 %v2269_v26, %v1032_v60 }
 0x39b   :  { %v1659_v49 = vpop.eup %1658  ;;  %v1258_v23 = vadd.f32 %v1657_v50, %v1257_v18  ;;  %v1553_v58 = vmul.f32 -1.442695, %v1033_v48 }
 0x39c   :  { %v1661_v1 = vpop.eup %1660  ;;  %v1100_v45 = vadd.f32 1.0, %v1659_v49 }
 0x39d   :  { %v1262_v52 = vsel %vm1261_vm5, %v1657_v50, %v1258_v23  ;;  %v1270_v9 = vmul.f32 %v1661_v1, %v1099_v4  ;;  %1662 = vpow2.f32 %v1553_v58  ;;  %vm1275_vm7 = vweird.f32 %v1661_v1 }
 0x39e   :  { %v1267_v27 = vsel %vm1264_vm6, %v1266_v17, %v1262_v52  ;;  %1664 = vrcp.f32 %v1100_v45  ;;  %vm1276_vm9 = vmor %vm1274_vm8, %vm1275_vm7  ;;  %v1295_v31 = vand.u32 2147483648, %v1100_v45  ;;  %v1293_v12 = vand.u32 2147483647, %v1100_v45 }
 0x39f   :  { %1354 = vst [vmem:[#allocation7 + $0x50] sm:$0xff] %v1267_v27  ;;  %v1271_v53 = vsub.f32 1.0, %v1270_v9  ;;  %vm1289_vm12 = vweird.f32 %v1100_v45 }
 0x3a0   :  { %v1035_v54 = vpop.f32.mrf.mxu0  ;;  %v1296_v57 = vor.u32 1.1754944e-38, %v1295_v31  ;;  %vm1294_vm14 = vcmp.eq.f32.partialorder %v1293_v12, 8.507059e+37 }
 0x3a1   :  { %v1272_v55 = vmul.f32 %v1661_v1, %v1271_v53  ;;  %v1036_v61 = vadd.f32 %v2269_v26, %v1035_v54 }
 0x3a3   :  { %v1663_v63 = vpop.eup %1662  ;;  %v1273_v2 = vadd.f32 %v1661_v1, %v1272_v55  ;;  %v1554_v5 = vmul.f32 -1.442695, %v1036_v61 }
 0x3a4   :  { %v1665_v19 = vpop.eup %1664  ;;  %v1101_v6 = vadd.f32 1.0, %v1663_v63 }
 0x3a5   :  { %v1277_v20 = vsel %vm1276_vm9, %v1661_v1, %v1273_v2  ;;  %v1285_v32 = vmul.f32 %v1665_v19, %v1100_v45  ;;  %1666 = vpow2.f32 %v1554_v5  ;;  %vm1290_vm11 = vweird.f32 %v1665_v19 }
 0x3a6   :  { %v1282_v40 = vsel %vm1279_vm10, %v1281_v33, %v1277_v20  ;;  %1668 = vrcp.f32 %v1101_v6  ;;  %vm1291_vm13 = vmor %vm1289_vm12, %vm1290_vm11  ;;  %v1310_v14 = vand.u32 2147483648, %v1101_v6  ;;  %vm1304_vm0 = vweird.f32 %v1101_v6 }
 0x3a7   :  { %1355 = vst [vmem:[#allocation7 + $0x58] sm:$0xff] %v1282_v40  ;;  %v1286_v29 = vsub.f32 1.0, %v1285_v32 }
 0x3a8   :  { %v1037_v7 = vpop.f32.mrf.mxu0  ;;  %v1311_v36 = vor.u32 1.1754944e-38, %v1310_v14 }
 0x3a9   :  { %v1287_v24 = vmul.f32 %v1665_v19, %v1286_v29  ;;  %v1038_v8 = vadd.f32 %v2269_v26, %v1037_v7  ;;  %v1308_v26 = vand.u32 2147483647, %v1101_v6 }
 0x3ab   :  { %v1667_v37 = vpop.eup %1666  ;;  %v1288_v3 = vadd.f32 %v1665_v19, %v1287_v24  ;;  %v1555_v10 = vmul.f32 -1.442695, %v1038_v8  ;;  %vm1309_vm2 = vcmp.eq.f32.partialorder %v1308_v26, 8.507059e+37 }
 0x3ac   :  { %v1669_v11 = vpop.eup %1668  ;;  %v1102_v47 = vadd.f32 1.0, %v1667_v37 }
 0x3ad   :  { %v1292_v0 = vsel %vm1291_vm13, %v1665_v19, %v1288_v3  ;;  %v1300_v25 = vmul.f32 %v1669_v11, %v1101_v6  ;;  %1670 = vpow2.f32 %v1555_v10  ;;  %vm1305_vm15 = vweird.f32 %v1669_v11 }
 0x3ae   :  { %v1297_v13 = vsel %vm1294_vm14, %v1296_v57, %v1292_v0  ;;  %1672 = vrcp.f32 %v1102_v47  ;;  %vm1306_vm1 = vmor %vm1304_vm0, %vm1305_vm15  ;;  %v1325_v50 = vand.u32 2147483648, %v1102_v47  ;;  %v1323_v4 = vand.u32 2147483647, %v1102_v47 }
 0x3af   :  { %1356 = vst [vmem:[#allocation7 + $0x60] sm:$0xff] %v1297_v13  ;;  %v1301_v56 = vsub.f32 1.0, %v1300_v25  ;;  %vm1319_vm4 = vweird.f32 %v1102_v47 }
 0x3b0   :  { %v1326_v51 = vor.u32 1.1754944e-38, %v1325_v50  ;;  %vm1324_vm6 = vcmp.eq.f32.partialorder %v1323_v4, 8.507059e+37 }
 0x3b1   :  { %v1302_v44 = vmul.f32 %v1669_v11, %v1301_v56 }
 0x3b3   :  { %v1671_v46 = vpop.eup %1670  ;;  %v1303_v62 = vadd.f32 %v1669_v11, %v1302_v44 }
 0x3b4   :  { %v1673_v34 = vpop.eup %1672  ;;  %v1103_v35 = vadd.f32 1.0, %v1671_v46 }
 0x3b5   :  { %v1307_v39 = vsel %vm1306_vm1, %v1669_v11, %v1303_v62  ;;  %v1315_v42 = vmul.f32 %v1673_v34, %v1102_v47  ;;  %vm1320_vm3 = vweird.f32 %v1673_v34 }
 0x3b6   :  { %v1312_v22 = vsel %vm1309_vm2, %v1311_v36, %v1307_v39  ;;  %1674 = vrcp.f32 %v1103_v35  ;;  %vm1321_vm5 = vmor %vm1319_vm4, %vm1320_vm3  ;;  %v1340_v59 = vand.u32 2147483648, %v1103_v35  ;;  %v1338_v49 = vand.u32 2147483647, %v1103_v35 }
 0x3b7   :  { %1357 = vst [vmem:[#allocation7 + $0x68] sm:$0xff] %v1312_v22  ;;  %v1316_v21 = vsub.f32 1.0, %v1315_v42  ;;  %vm1334_vm8 = vweird.f32 %v1103_v35 }
 0x3b8   :  { %v1341_v58 = vor.u32 1.1754944e-38, %v1340_v59  ;;  %vm1339_vm10 = vcmp.eq.f32.partialorder %v1338_v49, 8.507059e+37 }
 0x3b9   :  { %v1317_v43 = vmul.f32 %v1673_v34, %v1316_v21 }
 0x3bb   :  { %v1318_v38 = vadd.f32 %v1673_v34, %v1317_v43 }
 0x3bc   :  { %v1675_v16 = vpop.eup %1674 }
 0x3bd   :  { %v1322_v41 = vsel %vm1321_vm5, %v1673_v34, %v1318_v38  ;;  %v1330_v15 = vmul.f32 %v1675_v16, %v1103_v35  ;;  %vm1335_vm7 = vweird.f32 %v1675_v16 }
 0x3be   :  { %v1327_v60 = vsel %vm1324_vm6, %v1326_v51, %v1322_v41  ;;  %vm1336_vm9 = vmor %vm1334_vm8, %vm1335_vm7 }
 0x3bf   :  { %1358 = vst [vmem:[#allocation7 + $0x70] sm:$0xff] %v1327_v60  ;;  %v1331_v18 = vsub.f32 1.0, %v1330_v15 }
 0x3c1   :  { %v1332_v48 = vmul.f32 %v1675_v16, %v1331_v18 }
 0x3c3   :  { %v1333_v23 = vadd.f32 %v1675_v16, %v1332_v48 }
 0x3c5   :  { %v1337_v1 = vsel %vm1336_vm9, %v1675_v16, %v1333_v23 }
 0x3c6   :  { %v1342_v17 = vsel %vm1339_vm10, %v1341_v58, %v1337_v1 }
 0x3c7   :  { %1359 = vst [vmem:[#allocation7 + $0x78] sm:$0xff] %v1342_v17 }
 0x3c8   :  { %1372 = dma.vmem_to_hbm [thread:$0]  %s1365_s8, 2048, %s1367_s19, [#allocation4], %s1755_s17, %s1755_s17, %s1756_s18  }
 0x3c9   :  { %1752 = dma.done.wait [#allocation4], 2048  }
 0x3ca   :  { %1753 = vsyncadd [#allocation4], 4294965248 }
 0x3cb   :  { %1377 = vsyncpa [#allocation3], 1 }
 0x3cc   :  { %1378 = vsyncpa [#allocation6], 1 }
 0x3cd   :  { %1379 = vsyncpa [#allocation4], 1 }

</bundles_post_ra>
